<compile_context>
chip_gen: v7x
topology: tpu7x:2x2x1
jax: 0.10.0
libtpu: 0.0.40
codegen_flags: <defaults>
</compile_context>

<pallas_src>
import functools

import jax
import jax.numpy as jnp
from jax.experimental import pallas as pl
from jax.experimental.pallas import tpu as pltpu


# ---------------------------------------------------------------------------
# In-kernel helpers (f32 elementwise math)
# ---------------------------------------------------------------------------
def _layer_norm(x, gamma, beta, eps=1e-5):
    # x: (M, D); gamma/beta: (1, D)  -- matches torch.nn.LayerNorm(dim)
    mean = jnp.mean(x, axis=-1, keepdims=True)
    var = jnp.mean((x - mean) ** 2, axis=-1, keepdims=True)
    return (x - mean) * jax.lax.rsqrt(var + eps) * gamma + beta


def _gelu_exact(x):
    # torch.nn.GELU() default is the exact (erf) formulation; kept for parity.
    return 0.5 * x * (1.0 + jax.lax.erf(x * (2.0 ** -0.5)))


# ---------------------------------------------------------------------------
# Pallas kernel: one transformer layer per grid step, activations carried in
# a VMEM scratch across the depth ("arbitrary") axis.
# ---------------------------------------------------------------------------
def transformer_kernel(
    x_ref,            # (block_b, N, D)            input activations
    vecs_ref,         # (1, 8, D)  f32  packed [ln1_g, ln1_b, b_out, ln2_g, ln2_b, b2, pad, pad]
    b1_ref,           # (1, 1, mlp) f32
    wqkv_ref,         # (1, D, 3*inner) bf16  (attention scale pre-folded into q columns)
    wout_ref,         # (1, inner, D)   bf16
    w1_ref,           # (1, D, mlp)     bf16
    w2_ref,           # (1, mlp, D)     bf16
    o_ref,            # (block_b, N, D)
    x_scratch,        # (block_b*N, D) f32 -- persists across the depth axis
    *, heads, dim_head,
):
    block_b, N, D = x_ref.shape
    inner = heads * dim_head
    M = block_b * N
    bf16 = jnp.bfloat16
    l = pl.program_id(1)                       # layer index (inner, "arbitrary")

    @pl.when(l == 0)
    def _():
        x_scratch[...] = x_ref[...].reshape(M, D).astype(jnp.float32)

    x = x_scratch[...]                                           # (M, D) f32

    vecs = vecs_ref[0]                                           # (8, D)
    ln1_g, ln1_b = vecs[0:1], vecs[1:2]
    b_out = vecs[2:3]
    ln2_g, ln2_b = vecs[3:4], vecs[4:5]
    b2 = vecs[5:6]
    b1 = b1_ref[0]                                               # (1, mlp)

    # ----- PreNorm + multi-head self-attention -----
    h = _layer_norm(x, ln1_g, ln1_b)
    qkv = jnp.dot(h.astype(bf16), wqkv_ref[0],
                  preferred_element_type=jnp.float32)            # (M, 3*inner)

    def split_heads(t):
        # (M, inner) -> (block_b*heads, N, dim_head): (b, h) flattened into a
        # single leading batch dim so both einsums below are plain
        # leading-batch dot_generals (MXU-friendly, no per-row Python loop).
        t = t.reshape(block_b, N, heads, dim_head)
        t = jnp.swapaxes(t, 1, 2)                                # (b, h, N, d)
        return t.reshape(block_b * heads, N, dim_head)

    qh = split_heads(qkv[:, 0 * inner:1 * inner]).astype(bf16)   # scale pre-folded
    kh = split_heads(qkv[:, 1 * inner:2 * inner]).astype(bf16)
    vh = split_heads(qkv[:, 2 * inner:3 * inner]).astype(bf16)

    s = jnp.einsum("bnd,bmd->bnm", qh, kh,
                   preferred_element_type=jnp.float32)           # (b*h, N, N) f32
    s = s - jnp.max(s, axis=-1, keepdims=True)
    p = jnp.exp(s)
    attn = p * pl.reciprocal(jnp.sum(p, axis=-1, keepdims=True), approx=True)
    o = jnp.einsum("bnm,bmd->bnd", attn.astype(bf16), vh,
                   preferred_element_type=jnp.float32)           # (b*h, N, d)

    # (b*h, N, d) -> lane-dense (M, inner) slab for the output projection
    attn_out = jnp.swapaxes(o.reshape(block_b, heads, N, dim_head), 1, 2)
    attn_out = attn_out.reshape(M, inner)

    attn_out = jnp.dot(attn_out.astype(bf16), wout_ref[0],
                       preferred_element_type=jnp.float32) + b_out
    x = attn_out + x                                             # residual

    # ----- PreNorm + FeedForward (exact erf GELU, as in nn.GELU()) -----
    h2 = _layer_norm(x, ln2_g, ln2_b)
    h2 = jnp.dot(h2.astype(bf16), w1_ref[0],
                 preferred_element_type=jnp.float32) + b1
    h2 = _gelu_exact(h2)
    h2 = jnp.dot(h2.astype(bf16), w2_ref[0],
                 preferred_element_type=jnp.float32) + b2
    x = h2 + x                                                   # residual

    x_scratch[...] = x

    @pl.when(l == pl.num_programs(1) - 1)
    def _():
        o_ref[...] = x.reshape(block_b, N, D).astype(o_ref.dtype)


# ---------------------------------------------------------------------------
# Generation-aware sizing helpers
# ---------------------------------------------------------------------------
def _device_generation():
    try:
        kind = jax.devices()[0].device_kind.lower()
    except Exception:
        return 0
    for gen in (7, 6, 5, 4):
        if f"v{gen}" in kind or f"tpu{gen}" in kind:
            return gen
    return 0


def _vmem_capacity_bytes(gen):
    try:
        cap = getattr(pltpu.get_tpu_info(), "vmem_capacity_bytes", None)
        if cap:
            return int(cap)
    except Exception:
        pass
    # Fallback: v4/v5e/v6e have 128 MiB per core; v7x (and unknown) -> 64 MiB.
    return (128 if gen in (4, 5, 6) else 64) * 1024 * 1024


def _vmem_estimate_bytes(block_b, *, N, D, inner, mlp, heads):
    M = block_b * N
    w_l = 2 * (D * 3 * inner + inner * D + D * mlp + mlp * D)   # bf16 weights / layer
    v_l = 4 * (8 * D + mlp)                                     # packed f32 vectors / layer
    io = 4 * block_b * N * D                                    # one f32 activation block
    scratch = 4 * M * D                                         # persistent f32 carry
    attn_peak = 6 * M * 3 * inner + 6 * block_b * heads * N * N + 4 * M * inner
    mlp_peak = 6 * M * mlp + 4 * M * D
    interm = max(attn_peak, mlp_peak) + 8 * M * D
    return 2 * (w_l + v_l) + 4 * io + scratch + interm          # 2x = double-buffered


def _pick_block_b(B, *, budget, min_tiles, est_fn, max_b=8):
    for tb in range(min(B, max_b), 0, -1):
        if B % tb:
            continue
        if (B // tb) < min(min_tiles, B):
            continue                                            # keep both v7x TCs busy
        if est_fn(tb) <= budget:
            return tb
    return 1


# ---------------------------------------------------------------------------
# Wrapper
# ---------------------------------------------------------------------------
def transformer_forward(x, kparams, *, depth, heads, dim_head, block_b=None):
    B, N, D = x.shape
    inner = heads * dim_head
    mlp = kparams["w1"].shape[-1]
    assert kparams["w_qkv"].shape == (depth, D, 3 * inner)

    gen = _device_generation()
    capacity = _vmem_capacity_bytes(gen)
    budget = int(0.80 * capacity)          # headroom for compiler-internal scratch
    num_tc = 2 if gen >= 7 else 1          # v7x: 2 TensorCores per chip

    est_fn = functools.partial(_vmem_estimate_bytes,
                               N=N, D=D, inner=inner, mlp=mlp, heads=heads)
    if block_b is None:
        block_b = _pick_block_b(B, budget=budget, min_tiles=num_tc, est_fn=est_fn)
    assert B % block_b == 0

    grid = (B // block_b, depth)           # batch tiles (parallel), depth (arbitrary)

    def layer_spec(r, c):
        # one layer's parameters per grid step -> streamed + double-buffered
        return pl.BlockSpec((1, r, c), lambda b, l: (l, 0, 0))

    kernel = functools.partial(transformer_kernel, heads=heads, dim_head=dim_head)

    return pl.pallas_call(
        kernel,
        out_shape=jax.ShapeDtypeStruct((B, N, D), x.dtype),
        grid=grid,
        in_specs=[
            pl.BlockSpec((block_b, N, D), lambda b, l: (b, 0, 0)),   # x
            layer_spec(8, D),                                        # packed f32 vectors
            layer_spec(1, mlp),                                      # b1
            layer_spec(D, 3 * inner),                                # w_qkv (bf16)
            layer_spec(inner, D),                                    # w_out (bf16)
            layer_spec(D, mlp),                                      # w1    (bf16)
            layer_spec(mlp, D),                                      # w2    (bf16)
        ],
        out_specs=pl.BlockSpec((block_b, N, D), lambda b, l: (b, 0, 0)),
        scratch_shapes=[pltpu.VMEM((block_b * N, D), jnp.float32)],
        compiler_params=pltpu.CompilerParams(
            dimension_semantics=("parallel", "arbitrary"),
            vmem_limit_bytes=int(budget),
        ),
    )(
        x,
        kparams["vecs"], kparams["b1"],
        kparams["w_qkv"], kparams["w_out"], kparams["w1"], kparams["w2"],
    )


# ---------------------------------------------------------------------------
# Parameter initialization (raw f32) and one-time kernel-side packing
# ---------------------------------------------------------------------------
def init_params(key, *, depth, dim, heads, dim_head, mlp_dim):
    inner = heads * dim_head
    ks = jax.random.split(key, 6)
    std = 0.02
    return {
        "ln1_g": jnp.ones((depth, 1, dim), jnp.float32),
        "ln1_b": jnp.zeros((depth, 1, dim), jnp.float32),
        "w_qkv": std * jax.random.normal(ks[0], (depth, dim, 3 * inner), jnp.float32),
        "w_out": std * jax.random.normal(ks[1], (depth, inner, dim), jnp.float32),
        "b_out": std * jax.random.normal(ks[2], (depth, 1, dim), jnp.float32),
        "ln2_g": jnp.ones((depth, 1, dim), jnp.float32),
        "ln2_b": jnp.zeros((depth, 1, dim), jnp.float32),
        "w1": std * jax.random.normal(ks[3], (depth, dim, mlp_dim), jnp.float32),
        "b1": std * jax.random.normal(ks[4], (depth, 1, mlp_dim), jnp.float32),
        "w2": std * jax.random.normal(ks[5], (depth, mlp_dim, dim), jnp.float32),
        "b2": jnp.zeros((depth, 1, dim), jnp.float32),
    }


def pack_kernel_params(params, *, dim_head):
    """One-time host-side transform: fold attention scale into the q columns of
    w_qkv, cast matmul weights to bf16, and pack the 6 small per-layer f32
    vectors into a single (depth, 8, D) array."""
    depth, _, D = params["ln1_g"].shape
    inner = params["w_out"].shape[1]
    scale = dim_head ** (-0.5)
    w_qkv = jnp.concatenate(
        [params["w_qkv"][:, :, :inner] * scale, params["w_qkv"][:, :, inner:]],
        axis=-1)
    pad = jnp.zeros((depth, 1, D), jnp.float32)
    vecs = jnp.concatenate(
        [params["ln1_g"], params["ln1_b"], params["b_out"],
         params["ln2_g"], params["ln2_b"], params["b2"], pad, pad], axis=1)
    bf16 = jnp.bfloat16
    return {
        "vecs": vecs,                              # (depth, 8, D) f32
        "b1": params["b1"],                        # (depth, 1, mlp) f32
        "w_qkv": w_qkv.astype(bf16),               # (depth, D, 3*inner)
        "w_out": params["w_out"].astype(bf16),     # (depth, inner, D)
        "w1": params["w1"].astype(bf16),           # (depth, D, mlp)
        "w2": params["w2"].astype(bf16),           # (depth, mlp, D)
    }


# ---------------------------------------------------------------------------
# Pure-JAX reference (mirrors the PyTorch Transformer, dropout=0 / eval).
# Weights are round-tripped through bf16 (what the kernel stores) so the
# comparison isolates the kernel's bf16-at-MXU-input + approx-reciprocal error.
# ---------------------------------------------------------------------------
def transformer_reference(x, params, *, depth, heads, dim_head):
    def ln(t, g, b):
        m = jnp.mean(t, axis=-1, keepdims=True)
        v = jnp.mean((t - m) ** 2, axis=-1, keepdims=True)
        return (t - m) / jnp.sqrt(v + 1e-5) * g + b

    q16 = lambda a: a.astype(jnp.bfloat16).astype(jnp.float32)
    B, N, D = x.shape
    inner = heads * dim_head
    scale = dim_head ** (-0.5)
    for l in range(depth):
        h = ln(x, params["ln1_g"][l], params["ln1_b"][l])
        qkv = h @ q16(params["w_qkv"][l])
        q, k, v = jnp.split(qkv, 3, axis=-1)
        rh = lambda t: t.reshape(B, N, heads, dim_head).transpose(0, 2, 1, 3)
        q, k, v = map(rh, (q, k, v))
        dots = jnp.einsum("bhnd,bhmd->bhnm", q, k) * scale
        attn = jax.nn.softmax(dots, axis=-1)
        out = jnp.einsum("bhnm,bhmd->bhnd", attn, v)
        out = out.transpose(0, 2, 1, 3).reshape(B, N, inner)
        out = out @ q16(params["w_out"][l]) + params["b_out"][l]
        x = out + x
        h2 = ln(x, params["ln2_g"][l], params["ln2_b"][l])
        h2 = h2 @ q16(params["w1"][l]) + params["b1"][l]
        h2 = 0.5 * h2 * (1.0 + jax.lax.erf(h2 / jnp.sqrt(2.0)))
        h2 = h2 @ q16(params["w2"][l]) + params["b2"][l]
        x = h2 + x
    return x


if __name__ == "__main__":
    # Small config consistent with Transformer(dim, depth, heads, dim_head, mlp_dim)
    B, N = 2, 8
    dim, depth, heads, dim_head, mlp_dim = 32, 2, 4, 8, 64

    key = jax.random.PRNGKey(0)
    kx, kp = jax.random.split(key)
    x = jax.random.normal(kx, (B, N, dim), jnp.float32)
    raw_params = init_params(kp, depth=depth, dim=dim, heads=heads,
                             dim_head=dim_head, mlp_dim=mlp_dim)
    kparams = pack_kernel_params(raw_params, dim_head=dim_head)

    out = transformer_forward(x, kparams, depth=depth, heads=heads, dim_head=dim_head)
    out = jax.block_until_ready(out)

    ref = transformer_reference(x, raw_params, depth=depth, heads=heads,
                                dim_head=dim_head)
    assert out.shape == (B, N, dim)
    # bf16 MXU inputs + EUP approx reciprocal in the kernel vs f32 reference.
    assert jnp.allclose(out, ref, atol=1e-2, rtol=1e-2), "mismatch vs JAX reference"

    print("KERNEL_OK")
</pallas_src>

<mosaic_0001>
module attributes {stable_mosaic.version = 11 : i64} {
  func.func @transformer_kernel(%arg0: i32, %arg1: i32, %arg2: memref<2x8x32xf32, #tpu.memory_space<vmem>>, %arg3: memref<1x8x32xf32, #tpu.memory_space<vmem>>, %arg4: memref<1x1x64xf32, #tpu.memory_space<vmem>>, %arg5: memref<1x32x96xbf16, #tpu.memory_space<vmem>>, %arg6: memref<1x32x32xbf16, #tpu.memory_space<vmem>>, %arg7: memref<1x32x64xbf16, #tpu.memory_space<vmem>>, %arg8: memref<1x64x32xbf16, #tpu.memory_space<vmem>>, %arg9: memref<2x8x32xf32, #tpu.memory_space<vmem>>, %arg10: memref<16x32xf32, #tpu.memory_space<vmem>>) attributes {dimension_semantics = [#tpu.dimension_semantics<parallel>, #tpu.dimension_semantics<arbitrary>], iteration_bounds = array<i64: 1, 2>, scalar_prefetch = 0 : i64, scratch_operands = 1 : i64, tpu.core_type = #tpu.core_type<tc>, window_params = [{transform_indices = @transform_0, window_bounds = array<i64: 2, 8, 32>}, {transform_indices = @transform_1, window_bounds = array<i64: 1, 8, 32>}, {transform_indices = @transform_2, window_bounds = array<i64: 1, 1, 64>}, {transform_indices = @transform_3, window_bounds = array<i64: 1, 32, 96>}, {transform_indices = @transform_4, window_bounds = array<i64: 1, 32, 32>}, {transform_indices = @transform_5, window_bounds = array<i64: 1, 32, 64>}, {transform_indices = @transform_6, window_bounds = array<i64: 1, 64, 32>}, {transform_indices = @transform_7, window_bounds = array<i64: 2, 8, 32>}]} {
    %c0_i32 = arith.constant 0 : i32
    %0 = arith.cmpi eq, %arg1, %c0_i32 : i32
    %1 = arith.extui %0 : i1 to i32
    %c0_i32_0 = arith.constant 0 : i32
    %2 = arith.cmpi ne, %1, %c0_i32_0 : i32
    scf.if %2 {
      %c0_43 = arith.constant 0 : index
      %c0_44 = arith.constant 0 : index
      %c0_45 = arith.constant 0 : index
      %125 = vector.load %arg2[%c0_43, %c0_44, %c0_45] : memref<2x8x32xf32, #tpu.memory_space<vmem>>, vector<2x8x32xf32>
      %126 = vector.shape_cast %125 : vector<2x8x32xf32> to vector<16x32xf32>
      %c0_46 = arith.constant 0 : index
      %c0_47 = arith.constant 0 : index
      %127 = vector.load %arg10[%c0_46, %c0_47] : memref<16x32xf32, #tpu.memory_space<vmem>>, vector<16x32xf32>
      tpu.vector_store %arg10[%c0_46, %c0_47], %126 {strides = array<i32>} : memref<16x32xf32, #tpu.memory_space<vmem>>, vector<16x32xf32>,
    } else {
    }
    %c0 = arith.constant 0 : index
    %c0_1 = arith.constant 0 : index
    %3 = vector.load %arg10[%c0, %c0_1] : memref<16x32xf32, #tpu.memory_space<vmem>>, vector<16x32xf32>
    %c0_2 = arith.constant 0 : index
    %c0_3 = arith.constant 0 : index
    %c0_4 = arith.constant 0 : index
    %4 = vector.load %arg3[%c0_2, %c0_3, %c0_4] : memref<1x8x32xf32, #tpu.memory_space<vmem>>, vector<1x8x32xf32>
    %5 = vector.shape_cast %4 : vector<1x8x32xf32> to vector<8x32xf32>
    %6 = vector.extract_strided_slice %5 {offsets = [0, 0], sizes = [1, 32], strides = [1, 1]} : vector<8x32xf32> to vector<1x32xf32>
    %7 = vector.extract_strided_slice %5 {offsets = [1, 0], sizes = [1, 32], strides = [1, 1]} : vector<8x32xf32> to vector<1x32xf32>
    %8 = vector.extract_strided_slice %5 {offsets = [2, 0], sizes = [1, 32], strides = [1, 1]} : vector<8x32xf32> to vector<1x32xf32>
    %9 = vector.extract_strided_slice %5 {offsets = [3, 0], sizes = [1, 32], strides = [1, 1]} : vector<8x32xf32> to vector<1x32xf32>
    %10 = vector.extract_strided_slice %5 {offsets = [4, 0], sizes = [1, 32], strides = [1, 1]} : vector<8x32xf32> to vector<1x32xf32>
    %11 = vector.extract_strided_slice %5 {offsets = [5, 0], sizes = [1, 32], strides = [1, 1]} : vector<8x32xf32> to vector<1x32xf32>
    %c0_5 = arith.constant 0 : index
    %c0_6 = arith.constant 0 : index
    %c0_7 = arith.constant 0 : index
    %12 = vector.load %arg4[%c0_5, %c0_6, %c0_7] : memref<1x1x64xf32, #tpu.memory_space<vmem>>, vector<1x1x64xf32>
    %13 = vector.shape_cast %12 : vector<1x1x64xf32> to vector<1x64xf32>
    %cst = arith.constant dense<0.000000e+00> : vector<16xf32>
    %14 = vector.multi_reduction <add>, %3, %cst [1] : vector<16x32xf32> to vector<16xf32>
    %15 = vector.shape_cast %14 : vector<16xf32> to vector<16x1xf32>
    %cst_8 = arith.constant 3.200000e+01 : f32
    %16 = vector.broadcast %cst_8 : f32 to vector<16x1xf32>
    %17 = arith.divf %15, %16 : vector<16x1xf32>
    %18 = vector.broadcast %17 : vector<16x1xf32> to vector<16x32xf32>
    %19 = arith.subf %3, %18 : vector<16x32xf32>
    %20 = arith.mulf %19, %19 : vector<16x32xf32>
    %cst_9 = arith.constant dense<0.000000e+00> : vector<16xf32>
    %21 = vector.multi_reduction <add>, %20, %cst_9 [1] : vector<16x32xf32> to vector<16xf32>
    %22 = vector.shape_cast %21 : vector<16xf32> to vector<16x1xf32>
    %cst_10 = arith.constant 3.200000e+01 : f32
    %23 = vector.broadcast %cst_10 : f32 to vector<16x1xf32>
    %24 = arith.divf %22, %23 : vector<16x1xf32>
    %25 = vector.broadcast %17 : vector<16x1xf32> to vector<16x32xf32>
    %26 = arith.subf %3, %25 : vector<16x32xf32>
    %cst_11 = arith.constant 9.99999974E-6 : f32
    %27 = vector.broadcast %cst_11 : f32 to vector<16x1xf32>
    %28 = arith.addf %24, %27 : vector<16x1xf32>
    %29 = math.rsqrt %28 : vector<16x1xf32>
    %30 = vector.broadcast %29 : vector<16x1xf32> to vector<16x32xf32>
    %31 = arith.mulf %26, %30 : vector<16x32xf32>
    %32 = vector.broadcast %6 : vector<1x32xf32> to vector<16x32xf32>
    %33 = arith.mulf %31, %32 : vector<16x32xf32>
    %34 = vector.broadcast %7 : vector<1x32xf32> to vector<16x32xf32>
    %35 = arith.addf %33, %34 : vector<16x32xf32>
    %36 = arith.truncf %35 : vector<16x32xf32> to vector<16x32xbf16>
    %c0_12 = arith.constant 0 : index
    %c0_13 = arith.constant 0 : index
    %c0_14 = arith.constant 0 : index
    %37 = vector.load %arg5[%c0_12, %c0_13, %c0_14] : memref<1x32x96xbf16, #tpu.memory_space<vmem>>, vector<1x32x96xbf16>
    %38 = vector.shape_cast %37 : vector<1x32x96xbf16> to vector<32x96xbf16>
    %cst_15 = arith.constant dense<0.000000e+00> : vector<16x96xf32>
    %39 = tpu.matmul %36, %38, %cst_15 {dimension_numbers = #tpu.dot_dimension_numbers<[1], [0], [0], [1], [0, 0, 1, 1], [], []>} : vector<16x32xbf16>, vector<32x96xbf16>, vector<16x96xf32> -> vector<16x96xf32>
    %40 = vector.extract_strided_slice %39 {offsets = [0, 0], sizes = [16, 32], strides = [1, 1]} : vector<16x96xf32> to vector<16x32xf32>
    %41 = vector.shape_cast %40 : vector<16x32xf32> to vector<2x8x4x8xf32>
    %42 = tpu.transpose %41, [0, 2, 1, 3] : vector<2x8x4x8xf32> -> vector<2x4x8x8xf32>
    %43 = vector.shape_cast %42 : vector<2x4x8x8xf32> to vector<8x8x8xf32>
    %44 = arith.truncf %43 : vector<8x8x8xf32> to vector<8x8x8xbf16>
    %45 = vector.extract_strided_slice %39 {offsets = [0, 32], sizes = [16, 32], strides = [1, 1]} : vector<16x96xf32> to vector<16x32xf32>
    %46 = vector.shape_cast %45 : vector<16x32xf32> to vector<2x8x4x8xf32>
    %47 = tpu.transpose %46, [0, 2, 1, 3] : vector<2x8x4x8xf32> -> vector<2x4x8x8xf32>
    %48 = vector.shape_cast %47 : vector<2x4x8x8xf32> to vector<8x8x8xf32>
    %49 = arith.truncf %48 : vector<8x8x8xf32> to vector<8x8x8xbf16>
    %50 = vector.extract_strided_slice %39 {offsets = [0, 64], sizes = [16, 32], strides = [1, 1]} : vector<16x96xf32> to vector<16x32xf32>
    %51 = vector.shape_cast %50 : vector<16x32xf32> to vector<2x8x4x8xf32>
    %52 = tpu.transpose %51, [0, 2, 1, 3] : vector<2x8x4x8xf32> -> vector<2x4x8x8xf32>
    %53 = vector.shape_cast %52 : vector<2x4x8x8xf32> to vector<8x8x8xf32>
    %54 = arith.truncf %53 : vector<8x8x8xf32> to vector<8x8x8xbf16>
    "tpu.trace_start"() <{level = 10 : i32, message = "bnd,bmd->bnm"}> : () -> ()
    %cst_16 = arith.constant dense<0.000000e+00> : vector<8x8x8xf32>
    %55 = tpu.matmul %44, %49, %cst_16 {dimension_numbers = #tpu.dot_dimension_numbers<[2], [2], [1], [1], [0, 0, 0, 1, 1, 1], [0], [0]>} : vector<8x8x8xbf16>, vector<8x8x8xbf16>, vector<8x8x8xf32> -> vector<8x8x8xf32>
    "tpu.trace_stop"() : () -> ()
    %cst_17 = arith.constant dense<0xFF800000> : vector<8x8xf32>
    %56 = vector.multi_reduction <maximumf>, %55, %cst_17 [2] : vector<8x8x8xf32> to vector<8x8xf32>
    %57 = vector.shape_cast %56 : vector<8x8xf32> to vector<8x8x1xf32>
    %58 = vector.broadcast %57 : vector<8x8x1xf32> to vector<8x8x8xf32>
    %59 = arith.subf %55, %58 : vector<8x8x8xf32>
    %60 = math.exp %59 : vector<8x8x8xf32>
    %cst_18 = arith.constant dense<0.000000e+00> : vector<8x8xf32>
    %61 = vector.multi_reduction <add>, %60, %cst_18 [2] : vector<8x8x8xf32> to vector<8x8xf32>
    %62 = vector.shape_cast %61 : vector<8x8xf32> to vector<8x8x1xf32>
    %63 = tpu.reciprocal %62 {approx = true} : vector<8x8x1xf32> -> vector<8x8x1xf32>
    %64 = vector.broadcast %63 : vector<8x8x1xf32> to vector<8x8x8xf32>
    %65 = arith.mulf %60, %64 : vector<8x8x8xf32>
    %66 = arith.truncf %65 : vector<8x8x8xf32> to vector<8x8x8xbf16>
    "tpu.trace_start"() <{level = 10 : i32, message = "bnm,bmd->bnd"}> : () -> ()
    %cst_19 = arith.constant dense<0.000000e+00> : vector<8x8x8xf32>
    %67 = tpu.matmul %66, %54, %cst_19 {dimension_numbers = #tpu.dot_dimension_numbers<[2], [1], [1], [2], [0, 0, 0, 1, 1, 2], [0], [0]>} : vector<8x8x8xbf16>, vector<8x8x8xbf16>, vector<8x8x8xf32> -> vector<8x8x8xf32>
    "tpu.trace_stop"() : () -> ()
    %68 = vector.shape_cast %67 : vector<8x8x8xf32> to vector<2x4x8x8xf32>
    %69 = tpu.transpose %68, [0, 2, 1, 3] : vector<2x4x8x8xf32> -> vector<2x8x4x8xf32>
    %70 = vector.shape_cast %69 : vector<2x8x4x8xf32> to vector<16x32xf32>
    %71 = arith.truncf %70 : vector<16x32xf32> to vector<16x32xbf16>
    %c0_20 = arith.constant 0 : index
    %c0_21 = arith.constant 0 : index
    %c0_22 = arith.constant 0 : index
    %72 = vector.load %arg6[%c0_20, %c0_21, %c0_22] : memref<1x32x32xbf16, #tpu.memory_space<vmem>>, vector<1x32x32xbf16>
    %73 = vector.shape_cast %72 : vector<1x32x32xbf16> to vector<32x32xbf16>
    %cst_23 = arith.constant dense<0.000000e+00> : vector<16x32xf32>
    %74 = tpu.matmul %71, %73, %cst_23 {dimension_numbers = #tpu.dot_dimension_numbers<[1], [0], [0], [1], [0, 0, 1, 1], [], []>} : vector<16x32xbf16>, vector<32x32xbf16>, vector<16x32xf32> -> vector<16x32xf32>
    %75 = vector.broadcast %8 : vector<1x32xf32> to vector<16x32xf32>
    %76 = arith.addf %74, %75 : vector<16x32xf32>
    %77 = arith.addf %76, %3 : vector<16x32xf32>
    %cst_24 = arith.constant dense<0.000000e+00> : vector<16xf32>
    %78 = vector.multi_reduction <add>, %77, %cst_24 [1] : vector<16x32xf32> to vector<16xf32>
    %79 = vector.shape_cast %78 : vector<16xf32> to vector<16x1xf32>
    %cst_25 = arith.constant 3.200000e+01 : f32
    %80 = vector.broadcast %cst_25 : f32 to vector<16x1xf32>
    %81 = arith.divf %79, %80 : vector<16x1xf32>
    %82 = vector.broadcast %81 : vector<16x1xf32> to vector<16x32xf32>
    %83 = arith.subf %77, %82 : vector<16x32xf32>
    %84 = arith.mulf %83, %83 : vector<16x32xf32>
    %cst_26 = arith.constant dense<0.000000e+00> : vector<16xf32>
    %85 = vector.multi_reduction <add>, %84, %cst_26 [1] : vector<16x32xf32> to vector<16xf32>
    %86 = vector.shape_cast %85 : vector<16xf32> to vector<16x1xf32>
    %cst_27 = arith.constant 3.200000e+01 : f32
    %87 = vector.broadcast %cst_27 : f32 to vector<16x1xf32>
    %88 = arith.divf %86, %87 : vector<16x1xf32>
    %89 = vector.broadcast %81 : vector<16x1xf32> to vector<16x32xf32>
    %90 = arith.subf %77, %89 : vector<16x32xf32>
    %cst_28 = arith.constant 9.99999974E-6 : f32
    %91 = vector.broadcast %cst_28 : f32 to vector<16x1xf32>
    %92 = arith.addf %88, %91 : vector<16x1xf32>
    %93 = math.rsqrt %92 : vector<16x1xf32>
    %94 = vector.broadcast %93 : vector<16x1xf32> to vector<16x32xf32>
    %95 = arith.mulf %90, %94 : vector<16x32xf32>
    %96 = vector.broadcast %9 : vector<1x32xf32> to vector<16x32xf32>
    %97 = arith.mulf %95, %96 : vector<16x32xf32>
    %98 = vector.broadcast %10 : vector<1x32xf32> to vector<16x32xf32>
    %99 = arith.addf %97, %98 : vector<16x32xf32>
    %100 = arith.truncf %99 : vector<16x32xf32> to vector<16x32xbf16>
    %c0_29 = arith.constant 0 : index
    %c0_30 = arith.constant 0 : index
    %c0_31 = arith.constant 0 : index
    %101 = vector.load %arg7[%c0_29, %c0_30, %c0_31] : memref<1x32x64xbf16, #tpu.memory_space<vmem>>, vector<1x32x64xbf16>
    %102 = vector.shape_cast %101 : vector<1x32x64xbf16> to vector<32x64xbf16>
    %cst_32 = arith.constant dense<0.000000e+00> : vector<16x64xf32>
    %103 = tpu.matmul %100, %102, %cst_32 {dimension_numbers = #tpu.dot_dimension_numbers<[1], [0], [0], [1], [0, 0, 1, 1], [], []>} : vector<16x32xbf16>, vector<32x64xbf16>, vector<16x64xf32> -> vector<16x64xf32>
    %104 = vector.broadcast %13 : vector<1x64xf32> to vector<16x64xf32>
    %105 = arith.addf %103, %104 : vector<16x64xf32>
    %cst_33 = arith.constant 5.000000e-01 : f32
    %106 = vector.broadcast %cst_33 : f32 to vector<16x64xf32>
    %107 = arith.mulf %106, %105 : vector<16x64xf32>
    %cst_34 = arith.constant 0.707106769 : f32
    %108 = vector.broadcast %cst_34 : f32 to vector<16x64xf32>
    %109 = arith.mulf %105, %108 : vector<16x64xf32>
    %110 = math.erf %109 : vector<16x64xf32>
    %cst_35 = arith.constant 1.000000e+00 : f32
    %111 = vector.broadcast %cst_35 : f32 to vector<16x64xf32>
    %112 = arith.addf %111, %110 : vector<16x64xf32>
    %113 = arith.mulf %107, %112 : vector<16x64xf32>
    %114 = arith.truncf %113 : vector<16x64xf32> to vector<16x64xbf16>
    %c0_36 = arith.constant 0 : index
    %c0_37 = arith.constant 0 : index
    %c0_38 = arith.constant 0 : index
    %115 = vector.load %arg8[%c0_36, %c0_37, %c0_38] : memref<1x64x32xbf16, #tpu.memory_space<vmem>>, vector<1x64x32xbf16>
    %116 = vector.shape_cast %115 : vector<1x64x32xbf16> to vector<64x32xbf16>
    %cst_39 = arith.constant dense<0.000000e+00> : vector<16x32xf32>
    %117 = tpu.matmul %114, %116, %cst_39 {dimension_numbers = #tpu.dot_dimension_numbers<[1], [0], [0], [1], [0, 0, 1, 1], [], []>} : vector<16x64xbf16>, vector<64x32xbf16>, vector<16x32xf32> -> vector<16x32xf32>
    %118 = vector.broadcast %11 : vector<1x32xf32> to vector<16x32xf32>
    %119 = arith.addf %117, %118 : vector<16x32xf32>
    %120 = arith.addf %119, %77 : vector<16x32xf32>
    %c0_40 = arith.constant 0 : index
    %c0_41 = arith.constant 0 : index
    %121 = vector.load %arg10[%c0_40, %c0_41] : memref<16x32xf32, #tpu.memory_space<vmem>>, vector<16x32xf32>
    tpu.vector_store %arg10[%c0_40, %c0_41], %120 {strides = array<i32>} : memref<16x32xf32, #tpu.memory_space<vmem>>, vector<16x32xf32>,
    %c1_i32 = arith.constant 1 : i32
    %122 = arith.cmpi eq, %arg1, %c1_i32 : i32
    %123 = arith.extui %122 : i1 to i32
    %c0_i32_42 = arith.constant 0 : i32
    %124 = arith.cmpi ne, %123, %c0_i32_42 : i32
    scf.if %124 {
      %125 = vector.shape_cast %120 : vector<16x32xf32> to vector<2x8x32xf32>
      %c0_43 = arith.constant 0 : index
      %c0_44 = arith.constant 0 : index
      %c0_45 = arith.constant 0 : index
      %126 = vector.load %arg9[%c0_43, %c0_44, %c0_45] : memref<2x8x32xf32, #tpu.memory_space<vmem>>, vector<2x8x32xf32>
      tpu.vector_store %arg9[%c0_43, %c0_44, %c0_45], %125 {strides = array<i32>} : memref<2x8x32xf32, #tpu.memory_space<vmem>>, vector<2x8x32xf32>,
    } else {
    }
    return
  }
  func.func @transform_0(%arg0: i32, %arg1: i32) -> (i32, i32, i32) {
    %c0_i32 = arith.constant 0 : i32
    %c0_i32_0 = arith.constant 0 : i32
    %c0_i32_1 = arith.constant 0 : i32
    return %arg0, %c0_i32, %c0_i32_0 : i32, i32, i32
  }
  func.func @transform_1(%arg0: i32, %arg1: i32) -> (i32, i32, i32) {
    %c0_i32 = arith.constant 0 : i32
    %c0_i32_0 = arith.constant 0 : i32
    %c0_i32_1 = arith.constant 0 : i32
    return %arg1, %c0_i32, %c0_i32_0 : i32, i32, i32
  }
  func.func @transform_2(%arg0: i32, %arg1: i32) -> (i32, i32, i32) {
    %c0_i32 = arith.constant 0 : i32
    %c0_i32_0 = arith.constant 0 : i32
    %c0_i32_1 = arith.constant 0 : i32
    return %arg1, %c0_i32, %c0_i32_0 : i32, i32, i32
  }
  func.func @transform_3(%arg0: i32, %arg1: i32) -> (i32, i32, i32) {
    %c0_i32 = arith.constant 0 : i32
    %c0_i32_0 = arith.constant 0 : i32
    %c0_i32_1 = arith.constant 0 : i32
    return %arg1, %c0_i32, %c0_i32_0 : i32, i32, i32
  }
  func.func @transform_4(%arg0: i32, %arg1: i32) -> (i32, i32, i32) {
    %c0_i32 = arith.constant 0 : i32
    %c0_i32_0 = arith.constant 0 : i32
    %c0_i32_1 = arith.constant 0 : i32
    return %arg1, %c0_i32, %c0_i32_0 : i32, i32, i32
  }
  func.func @transform_5(%arg0: i32, %arg1: i32) -> (i32, i32, i32) {
    %c0_i32 = arith.constant 0 : i32
    %c0_i32_0 = arith.constant 0 : i32
    %c0_i32_1 = arith.constant 0 : i32
    return %arg1, %c0_i32, %c0_i32_0 : i32, i32, i32
  }
  func.func @transform_6(%arg0: i32, %arg1: i32) -> (i32, i32, i32) {
    %c0_i32 = arith.constant 0 : i32
    %c0_i32_0 = arith.constant 0 : i32
    %c0_i32_1 = arith.constant 0 : i32
    return %arg1, %c0_i32, %c0_i32_0 : i32, i32, i32
  }
  func.func @transform_7(%arg0: i32, %arg1: i32) -> (i32, i32, i32) {
    %c0_i32 = arith.constant 0 : i32
    %c0_i32_0 = arith.constant 0 : i32
    %c0_i32_1 = arith.constant 0 : i32
    return %arg0, %c0_i32, %c0_i32_0 : i32, i32, i32
  }
}

</mosaic_0001>

<bundles_post_ra>
// kernel: tpu_custom_call.1
= control target key start
LH: loop header
LB: loop body
LE: loop exit
PB: predicated region body
PF: predicated region fallthrough
CT: control target
= control target key end

     0   :  { %12 = vsyncpa [#allocation4], 0  ;;  %s4295_s0 = inlined_call_operand.hbm [shape: f32[2,8,32], index: 0, kind: input, shape index: {}]   ;;  %s4296_s1 = inlined_call_operand.hbm [shape: f32[2,8,32], index: 1, kind: input, shape index: {}]   ;;  %s4297_s2 = inlined_call_operand.vmem [shape: f32[2,1,64], index: 2, kind: input, shape index: {}]   ;;  %s4298_s3 = inlined_call_operand.vmem [shape: bf16[2,32,96], index: 3, kind: input, shape index: {}]   ;;  %s4299_s4 = inlined_call_operand.vmem [shape: bf16[2,32,32], index: 4, kind: input, shape index: {}]   ;;  %s4300_s5 = inlined_call_operand.vmem [shape: bf16[2,32,64], index: 5, kind: input, shape index: {}]   ;;  %s4301_s6 = inlined_call_operand.vmem [shape: bf16[2,64,32], index: 6, kind: input, shape index: {}]   ;;  %s4302_s7 = inlined_call_operand.hbm [shape: f32[2,8,32], index: 7, kind: output, shape index: {}]  }
   0x1   :  { %13 = vsyncpa [#allocation7], 0 }
   0x2   :  { %15 = vsyncpa [#allocation7 + $0x1], 0 }
   0x3   :  { %16 = vsyncpa [#allocation5], 0  ;;  %s3611_s24 = smov 0   ;;  %s3613_s25 = smov 0  }
   0x4   :  { %s3615_s26 = smov 0   ;;  %s3617_s27 = smov 0  }
   0x5   :  { %s3619_s28 = smov 0   ;;  %s3621_s29 = smov 0  }
   0x6 LB: > { %s4307_s30 = sadd.s32 4294967295, %s3551_s29   ;;  %p80_p0 = scmp.ne.s32.totalorder %s3535_s25, %s3531_s24  ;;  %s3551_s29 = sphi %s3621_s29, %s22_s29   ;;  %s3547_s28 = sphi %s3619_s28, %s4325_s28   ;;  %s3543_s27 = sphi %s3617_s27, %s4324_s27   ;;  %s3539_s26 = sphi %s3615_s26, %s4323_s26   ;;  %s3535_s25 = sphi %s3613_s25, %s4322_s25   ;;  %s3531_s24 = sphi %s3611_s24, %s4321_s24  }
   0x7   : > { %p3643_p1 = scmp.eq.s32.totalorder %s4307_s30, 0  ;;  %p2998_p2 = scmp.ge.s32.totalorder %s3551_s29, 1 }
   0x8   : > { %p247_p3 = scmp.lt.s32.totalorder %s3551_s29, 3  ;;  %s3553_s11 = smov [#allocation3]  }
   0x9   : > { %s4308_s8 = scalar_select %p3643_p1, 1, 0 }
   0xa   : > { %p3651_p4 = por %p3643_p1, %p80_p0  ;;  %p3655_p5 = pnand %p2998_p2, %p247_p3 }
   0xb   : > { %s262_s12 = sshll.u32 %s3553_s11, 4  ;;  %s31_s14 = sadd.s32 1, %s3547_s28  ;;  %s263_s12 = int_to_ptr.vmem [resolvable:$true] %s262_s12 }
   0xc   : > { %s4309_s9 = scalar_select %p3651_p4, 1, 0 }
   0xd   : > { %s4310_s10 = scalar_select %p3655_p5, 1, 0 }
   0xe   : > { %p3259_p6 = pneg %p3655_p5  ;;  %s3409_s17 = scalar_lea.hbm %s4295_s0, 256 }
   0xf   : > { %p3410_p8 = scmp.ne.s32.totalorder %s4295_s0, %s3409_s17  ;;  %p3416_p12 = scmp.lt.u32.totalorder %s3409_s17, %s4295_s0 }
  0x10   : > { %p3663_p7 = pnand %p3259_p6, %p3643_p1 }
  0x12   : > { %p3411_p9 = pneg %p3663_p7 }
  0x14   : > { %p3412_p10 = pnand %p3411_p9, %p3410_p8 }
  0x16   : > { %p3413_p11 = pneg %p3412_p10 }
  0x18   : > { %p3418_p13 = pnand %p3416_p12, %p3413_p11 }
  0x1a   : > { %3421 = shalt.err (!%p3418_p13)
}
  0x1b   : > { %s3422_s22 = scalar_lea.vmem %s263_s12, 256  ;;  %p3430_p6 = scmp.lt.s32.totalorder %s263_s12, %s263_s12 }
  0x1c   : > { %p3423_p0 = scmp.ne.s32.totalorder %s263_s12, %s3422_s22  ;;  %p3431_p4 = scmp.lt.s32.totalorder %s3422_s22, %s3422_s22 }
  0x1e   : > { %p3425_p2 = pnand %p3423_p0, %p3411_p9  ;;  %p3432_p1 = por %p3431_p4, %p3430_p6 }
  0x20   : > { %p3426_p3 = pneg %p3425_p2 }
  0x22   : > { %p3433_p5 = pnand %p3432_p1, %p3426_p3 }
  0x24   : > { %3436 = shalt.err (!%p3433_p5)
}
  0x25   : > { %s3554_s23 = smov 128   ;;  %s3555_s24 = smov 8  }
  0x26   : > { %3262 = dma.hbm_to_vmem [thread:$0]  (!%p3663_p7), %s4295_s0, 256, %s263_s12, [#allocation4], %s3554_s23, %s3554_s23, %s3555_s24  }
  0x27   : > { %p32_p4 = scmp.ge.s32.totalorder %s31_s14, 2  ;;  %s67_s16 = sadd.s32 1, %s3539_s26 }
  0x28   : > { %p74_p1 = scmp.ne.s32.totalorder %s3539_s26, %s3535_s25  ;;  %p75_p5 = scmp.eq.s32.totalorder %s3551_s29, 0 }
  0x29   : > { %s4327_s14 = smov (%p32_p4, %s31_s14), 0  ;;  %p3268_p9 = scmp.lt.s32.totalorder %s3551_s29, 2 }
  0x2a   : > { %p76_p8 = por %p75_p5, %p74_p1  ;;  %s64_s17 = ssub.s32 %s3547_s28, %s4327_s14 }
  0x2b   : > { %s276_s18 = sand.u32 1, %s3539_s26   ;;  %p65_p10 = scmp.eq.s32.totalorder %s64_s17, 0 }
  0x2c   : > { %s3001_s19 = sshll.u32 %s276_s18, 3  ;;  %s3002_s20 = sshll.u32 %s3547_s28, 7 }
  0x2d   : > { %s3696_s21 = scalar_select %p65_p10, %s3539_s26, %s67_s16  }
  0x2e   : > { %s3701_s12 = scalar_lea.hbm %s4296_s1, %s3002_s20  ;;  %s280_s23 = scalar_lea.vmem [#allocation6], %s3001_s19 }
  0x2f   : > { %s287_s24 = sshll.u32 %s280_s23, 4  ;;  %p3703_p7 = pnand %p3268_p9, %p76_p8  ;;  %s3707_s24 = int_to_ptr.vmem [resolvable:$true] %s287_s24 }
  0x30   : > { %s277_s15 = scalar_lea.sflag [#allocation7], %s276_s18  ;;  %s3437_s16 = scalar_lea.hbm %s3701_s12, 128 }
  0x31   : > { %p3438_p11 = scmp.ne.s32.totalorder %s3701_s12, %s3437_s16  ;;  %p3439_p12 = pneg %p3703_p7 }
  0x32   : > { %s3442_s20 = scalar_lea.hbm %s4296_s1, 256  ;;  %p3443_p2 = scmp.lt.u32.totalorder %s3701_s12, %s4296_s1 }
  0x33   : > { %p3440_p13 = pnand %p3439_p12, %p3438_p11  ;;  %p3444_p3 = scmp.lt.u32.totalorder %s3442_s20, %s3437_s16 }
  0x34   : > { %p3446_p4 = scmp.lt.u32.totalorder %s3437_s16, %s3701_s12 }
  0x35   : > { %p3441_p0 = pneg %p3440_p13  ;;  %p3445_p6 = por %p3444_p3, %p3443_p2 }
  0x37   : > { %p3447_p1 = por %p3446_p4, %p3445_p6 }
  0x39   : > { %p3448_p5 = pnand %p3447_p1, %p3441_p0 }
  0x3b   : > { %3451 = shalt.err (!%p3448_p5)
}
  0x3c   : > { %s3452_s18 = scalar_lea.vmem %s3707_s24, 128  ;;  %s3556_s23 = smov [#allocation6]  }
  0x3d   : > { %p3453_p8 = scmp.ne.s32.totalorder %s3707_s24, %s3452_s18  ;;  %s3457_s17 = sshll.u32 %s3556_s23, 4  ;;  %s3458_s17 = int_to_ptr.vmem [resolvable:$false] %s3457_s17 }
  0x3e   : > { %s3459_s19 = scalar_lea.vmem %s3458_s17, 256  ;;  %p3460_p11 = scmp.lt.s32.totalorder %s3707_s24, %s3458_s17 }
  0x3f   : > { %p3455_p9 = pnand %p3453_p8, %p3439_p12  ;;  %p3461_p13 = scmp.lt.s32.totalorder %s3459_s19, %s3452_s18 }
  0x41   : > { %p3456_p10 = pneg %p3455_p9  ;;  %p3462_p2 = por %p3461_p13, %p3460_p11 }
  0x43   : > { %p3463_p3 = pnand %p3462_p2, %p3456_p10 }
  0x45   : > { %3466 = shalt.err (!%p3463_p3)
}
  0x46   : > { %3266 = dma.hbm_to_vmem [thread:$0]  (!%p3703_p7), %s3701_s12, 128, %s3707_s24, %s277_s15  }
  0x47   : > { %p4313_p0 = scmp.ne.s32.totalorder %s4310_s10, 0 }
  0x48   : > { %p4314_p12 = scmp.ne.s32.totalorder (!%p4313_p0), %s4308_s8, 0 }
  0x49   : > { %334 = sbr.rel (%p4313_p0) target bundleno = 2861 (0xb2d), region = 48 }
  0x50   : > { %3518 = dma.done.wait (%p4314_p12), [#allocation4], 256  }
  0x51   : > { %3520 = vsyncadd (%p4314_p12), [#allocation4], 4294967040  ;;  %s340_s16 = sand.u32 1, %s3535_s25   ;;  %p4315_p6 = scmp.ne.s32.totalorder %s4309_s9, 0 }
  0x52   : > { %s3741_s20 = sshll.u32 %s340_s16, 3  ;;  %s341_s13 = scalar_lea.sflag [#allocation7], %s340_s16 }
  0x53   : > { %3522 = dma.done.wait (%p4315_p6), %s341_s13, 128  }
  0x54   : > { %3524 = vsyncadd (%p4315_p6), %s341_s13, 4294967168  ;;  %p394_p7 = scmp.lt.s32.totalorder %s3543_s27, 1  ;;  %p3014_p4 = scmp.ne.s32.totalorder %s3543_s27, 0 }
  0x55   : > { %v423_v0 = vld [vmem:[#allocation3] sm:$0xff] (!%p3014_p4)  ;;  %vm425_vm0 = vcmask (!%p3014_p4), 261120   ;;  %v424_v1 = vld [vmem:[#allocation3 + $0x8] sm:$0xff] (!%p3014_p4) }
  0x56   : > { %s3750_s10 = scalar_select %p394_p7, %s3543_s27, 1 }
  0x57   : > { %422 = sbr.rel (%p3014_p4) target bundleno = 94 (0x5e), region = 60  ;;  %426 = vst.msk [vmem:[#allocation2] sm:$0xff] (!%p3014_p4), %vm425_vm0, %v423_v0  ;;  %427 = vst.msk [vmem:[#allocation2 + $0x8] sm:$0xff] (!%p3014_p4), %vm425_vm0, %v424_v1 }
  0x58   : > { %s3067_s15 = sshll.u32 %s3750_s10, 4  ;;  %s3070_s8 = sshll.u32 %s3750_s10, 5 }
  0x59   : > { %s3760_s23 = scalar_lea.vmem %s4298_s3, %s3067_s15  ;;  %s3765_s19 = scalar_lea.vmem %s4299_s4, %s3067_s15 }
  0x5a   : > { %s3770_s30 = scalar_lea.vmem %s4300_s5, %s3067_s15  ;;  %s3776_s24 = scalar_lea.vmem %s4301_s6, %s3070_s8 }
  0x5e PF: > { %v428_v2 = vld [vmem:[#allocation2] sm:$0xff]  ;;  %vm432_vm1 = vcmask 261120   ;;  %v429_v3 = vld [vmem:[#allocation2 + $0x8] sm:$0xff]  ;;  %v3557_v17 = vmov 0.0   ;;  %vm3558_vm2 = vmmov 0   ;;  %v460_v23 = vlaneseq  ;;  %s4316_s11 = scalar_lea.vmem [#allocation6], %s3741_s20  ;;  %s4318_s8 = scalar_lea.vmem %s4297_s2, %s3750_s10 }
  0x5f   : > { %v433_v4 = vsel %vm432_vm1, %v428_v2, 0.0  ;;  %v436_v5 = vsel %vm432_vm1, %v429_v3, 0.0  ;;  %v3352_v16 = vld [vmem:[%s3760_s23] sm:$0xff]   ;;  %3117 = vmatprep.subr.bf16.mxu0 %v3557_v17  ;;  %3125 = vmatprep.subr.bf16.mxu1 %v3557_v17  ;;  %v3353_v18 = vld [vmem:[%s3760_s23 + $0x8] sm:$0xff]   ;;  %s3559_s15 = smov 112   ;;  %s3560_s22 = smov 120  }
  0x60   : > { %434 = vadd.xlane.f32.xlu0 %v433_v4  ;;  %3118 = vmatpush3.bf16.msra.mxu0 %v3352_v16  ;;  %v3793_v26 = vshrl.u32 %v460_v23, 7  ;;  %v430_v28 = vld [vmem:[%s4316_s11] sm:$0xff]  ;;  %s3561_s18 = smov 104   ;;  %s3562_s23 = smov 96   ;;  %v3563_v51 = vmov 1983009808  }
  0x61   : > { %3121 = vmatprep.mubr.msk.bf16.mxu0 %vm3558_vm2, %v3557_v17  ;;  %3119 = vmatprep.subr.bf16.mxu0 %v3557_v17  ;;  %v556_v52 = vunpack.c.l.s4 %v3563_v51  ;;  %v3564_v54 = vmov 1934713408   ;;  %vm1441_vm3 = vcmask 64512   ;;  %s3565_s9 = smov 64   ;;  %vm1909_vm4 = vcmask 1043456   ;;  %s3566_s17 = smov 16  }
  0x62   : > { %3127 = vmatprep.mubr.msk.bf16.mxu1 %vm3558_vm2, %v3557_v17  ;;  %v462_v27 = vsub.s32 0, %v3793_v26  ;;  %v468_v32 = vsub.s32 1, %v3793_v26  ;;  %v588_v55 = vunpack.c.l.s4 %v3564_v54  ;;  %s3568_s16 = smov 24   ;;  %vm2573_vm5 = vcmask 130048   ;;  %s4317_s13 = smov %s4316_s11 }
  0x63   : > { %v557_v53 = vunpack.c.0.s8 %v556_v52  ;;  %vm2576_vm6 = vcmask 195584   ;;  %vm2798_vm7 = vcmask 523264   ;;  %p3062_p1 = scmp.ne.s32.totalorder %s3543_s27, 1 }
  0x64   : > { %437 = vadd.xlane.f32.xlu0 %v436_v5  ;;  %3120 = vmatpush3.bf16.msra.mxu0 %v3353_v18  ;;  %v463_v31 = vrot.slane %v430_v28, %v462_v27  ;;  %v469_v36 = vrot.slane %v430_v28, %v468_v32  ;;  %v589_v61 = vunpack.c.0.s8 %v588_v55 }
  0x65   : > { %3131 = vmatprep.subr.bf16.mxu0 %v3557_v17  ;;  %v3837_v58 = vsub.s32 %v557_v53, %v3793_v26 }
  0xed   : > { %v435_v6 = vpop.xlane.xlu0 %434 }
  0xee   : > { %v440_v7 = vmul.f32 0.03125, %v435_v6 }
  0xf0   : > { %v442_v8 = vsub.f32 %v428_v2, %v440_v7  ;;  %v3848_v2 = vsub.s32 %v589_v61, %v3793_v26 }
  0xf1   : > { %v438_v9 = vpop.xlane.xlu0 %437 }
  0xf2   : > { %v441_v10 = vmul.f32 0.03125, %v438_v9  ;;  %v444_v11 = vmul.f32 %v442_v8, %v442_v8 }
  0xf4   : > { %v443_v12 = vsub.f32 %v429_v3, %v441_v10  ;;  %v446_v13 = vsel %vm432_vm1, %v444_v11, 0.0 }
  0xf5   : > { %447 = vadd.xlane.f32.xlu1 %v446_v13 }
  0xf6   : > { %v445_v14 = vmul.f32 %v443_v12, %v443_v12 }
  0xf8   : > { %v449_v15 = vsel %vm432_vm1, %v445_v14, 0.0 }
  0xf9   : > { %450 = vadd.xlane.f32.xlu1 %v449_v15 }
 0x182   : > { %v448_v19 = vpop.xlane.xlu1 %447 }
 0x183   : > { %v452_v20 = vmul.f32 0.03125, %v448_v19 }
 0x185   : > { %v454_v21 = vadd.f32 1e-05, %v452_v20 }
 0x186   : > { %v451_v22 = vpop.xlane.xlu1 %450 }
 0x187   : > { %3362 = vrsqrt.f32 %v454_v21  ;;  %v453_v24 = vmul.f32 0.03125, %v451_v22 }
 0x189   : > { %v455_v25 = vadd.f32 1e-05, %v453_v24 }
 0x18b   : > { %3364 = vrsqrt.f32 %v455_v25 }
 0x191   : > { %v3363_v29 = vpop.eup %3362 }
 0x192   : > { %v458_v30 = vmul.f32 %v3363_v29, %v442_v8 }
 0x194   : > { %v464_v35 = vmul.f32 %v463_v31, %v458_v30 }
 0x195   : > { %v3365_v33 = vpop.eup %3364 }
 0x196   : > { %v459_v34 = vmul.f32 %v3365_v33, %v443_v12  ;;  %v470_v38 = vadd.f32 %v469_v36, %v464_v35 }
 0x198   : > { %v465_v37 = vmul.f32 %v463_v31, %v459_v34 }
 0x19a   : > { %v471_v39 = vadd.f32 %v469_v36, %v465_v37 }
 0x19c   : > { %v472_v40 = vpack.c.bf16 %v471_v39, %v470_v38 }
 0x19e   : > { %3122 = vmatmul.mubr.msk.bf16.vlgmr.msra.gmra.mrb[0].mxu0 %vm432_vm1, %v472_v40 }
 0x19f   : > { %3133 = vmatprep.mubr.msk.bf16.mxu0 %vm3558_vm2, %v3557_v17 }
 0x271   : > { %v3802_v41 = vpop.f32.mrb[0].mxu0 }
 0x272   : > { %541 = vrot.lane.b32.xlu1 %v3802_v41, %s3559_s15  ;;  %535 = vrot.lane.b32.xlu0 %v3802_v41, %s3560_s22  ;;  %v3123_v42 = vpop.f32.mrb[1].mxu0 }
 0x273   : > { %v3806_v43 = vpop.f32.mrb[2].mxu0 }
 0x274   : > { %v3124_v44 = vpop.f32.mrb[3].mxu0 }
 0x276   : > { %547 = vrot.lane.b32.xlu1 %v3802_v41, %s3561_s18  ;;  %543 = vrot.lane.b32.xlu0 %v3806_v43, %s3559_s15 }
 0x27a   : > { %833 = vrot.lane.b32.xlu0 %v3802_v41, %s3562_s23  ;;  %537 = vrot.lane.b32.xlu1 %v3806_v43, %s3560_s22 }
 0x27e   : > { %549 = vrot.lane.b32.xlu1 %v3806_v43, %s3561_s18 }
 0x2e4   : > { %v3813_v45 = vpop.permute.xlu1 %541  ;;  %v3815_v46 = vpop.permute.xlu0 %535 }
 0x2e5   : > { %841 = vrot.lane.b32.xlu0 %v3813_v45, %s3562_s23  ;;  %837 = vrot.lane.b32.xlu1 %v3815_v46, %s3562_s23  ;;  %v553_v59 = vcombine.low %v3802_v41, %v3813_v45  ;;  %v554_v60 = vcombine.high %v3802_v41, %v3813_v45 }
 0x2e7   : > { %v561_v0 = vrot.slane %v553_v59, %v3837_v58  ;;  %v568_v1 = vrot.slane %v554_v60, %v3837_v58 }
 0x2e8   : > { %v3819_v47 = vpop.permute.xlu1 %547  ;;  %v3823_v48 = vpop.permute.xlu0 %543 }
 0x2e9   : > { %835 = vrot.lane.b32.xlu0 %v3806_v43, %s3562_s23  ;;  %845 = vrot.lane.b32.xlu1 %v3819_v47, %s3562_s23  ;;  %v569_v56 = vcombine.low %v3815_v46, %v3819_v47  ;;  %v570_v57 = vcombine.high %v3815_v46, %v3819_v47  ;;  %v621_v19 = vcombine.low %v3806_v43, %v3823_v48 }
 0x2ea   : > { %v622_v20 = vcombine.high %v3806_v43, %v3823_v48 }
 0x2eb   : > { %v577_v62 = vrot.slane %v569_v56, %v3837_v58  ;;  %v584_v63 = vrot.slane %v570_v57, %v3837_v58  ;;  %v629_v34 = vrot.slane %v621_v19, %v3837_v58 }
 0x2ec   : > { %v3825_v49 = vpop.permute.xlu1 %537  ;;  %v834_v7 = vpop.permute.xlu0 %833  ;;  %v3876_v35 = vrot.slane %v622_v20, %v3837_v58 }
 0x2ed   : > { %843 = vrot.lane.b32.xlu0 %v3823_v48, %s3562_s23  ;;  %839 = vrot.lane.b32.xlu1 %v3825_v49, %s3562_s23  ;;  %v585_v3 = vcombine.low %v561_v0, %v577_v62  ;;  %v586_v4 = vcombine.high %v561_v0, %v577_v62  ;;  %v601_v5 = vcombine.low %v568_v1, %v584_v63 }
 0x2ee   : > { %v602_v6 = vcombine.high %v568_v1, %v584_v63 }
 0x2ef   : > { %v593_v8 = vrot.slane %v585_v3, %v3848_v2  ;;  %v600_v9 = vrot.slane %v586_v4, %v3848_v2  ;;  %v609_v10 = vrot.slane %v601_v5, %v3848_v2 }
 0x2f0   : > { %v3829_v50 = vpop.permute.xlu1 %549  ;;  %v616_v11 = vrot.slane %v602_v6, %v3848_v2 }
 0x2f1   : > { %847 = vrot.lane.b32.xlu1 %v3829_v50, %s3562_s23  ;;  %v689_v14 = vcombine.low %v593_v8, %v600_v9  ;;  %v3018_v15 = vcombine.high %v593_v8, %v600_v9  ;;  %v637_v21 = vcombine.low %v3825_v49, %v3829_v50  ;;  %v638_v22 = vcombine.high %v3825_v49, %v3829_v50 }
 0x2f2   : > { %v705_v16 = vcombine.low %v609_v10, %v616_v11  ;;  %v3019_v18 = vcombine.high %v609_v10, %v616_v11 }
 0x2f3   : > { %v3863_v28 = vrot.slane %v689_v14, %v3837_v58  ;;  %v3866_v29 = vrot.slane %v3018_v15, %v3837_v58  ;;  %v645_v36 = vrot.slane %v637_v21, %v3837_v58  ;;  %v3880_v37 = vrot.slane %v638_v22, %v3837_v58 }
 0x2f4   : > { %v3869_v30 = vrot.slane %v705_v16, %v3837_v58  ;;  %v3872_v31 = vrot.slane %v3019_v18, %v3837_v58 }
 0x2f5   : > { %v721_v51 = vcombine.low %v3863_v28, %v3866_v29  ;;  %v722_v52 = vcombine.high %v3863_v28, %v3866_v29  ;;  %v653_v61 = vcombine.low %v629_v34, %v645_v36  ;;  %v654_v62 = vcombine.high %v629_v34, %v645_v36 }
 0x2f6   : > { %v737_v53 = vcombine.low %v3869_v30, %v3872_v31  ;;  %v738_v54 = vcombine.high %v3869_v30, %v3872_v31  ;;  %v669_v63 = vcombine.low %v3876_v35, %v3880_v37  ;;  %v670_v0 = vcombine.high %v3876_v35, %v3880_v37 }
 0x2f7   : > { %v729_v9 = vrot.slane %v721_v51, %v3848_v2  ;;  %v3905_v15 = vrot.slane %v653_v61, %v3848_v2  ;;  %v3908_v16 = vrot.slane %v654_v62, %v3848_v2 }
 0x2f8   : > { %v745_v10 = vrot.slane %v737_v53, %v3848_v2  ;;  %v684_v61 = vrot.slane %v670_v0, %v3848_v2 }
 0x357   : > { %v842_v12 = vpop.permute.xlu0 %841  ;;  %v838_v13 = vpop.permute.xlu1 %837 }
 0x358   : > { %v857_v23 = vcombine.low %v834_v7, %v842_v12  ;;  %v858_v24 = vcombine.high %v834_v7, %v842_v12 }
 0x35a   : > { %v865_v38 = vrot.slane %v857_v23, %v3837_v58  ;;  %v872_v39 = vrot.slane %v858_v24, %v3837_v58 }
 0x35b   : > { %v836_v25 = vpop.permute.xlu0 %835  ;;  %v846_v27 = vpop.permute.xlu1 %845 }
 0x35c   : > { %v873_v32 = vcombine.low %v838_v13, %v846_v27  ;;  %v874_v33 = vcombine.high %v838_v13, %v846_v27 }
 0x35e   : > { %v881_v40 = vrot.slane %v873_v32, %v3837_v58  ;;  %v888_v42 = vrot.slane %v874_v33, %v3837_v58 }
 0x35f   : > { %v840_v44 = vpop.permute.xlu1 %839  ;;  %v844_v60 = vpop.permute.xlu0 %843 }
 0x360   : > { %v889_v55 = vcombine.low %v865_v38, %v881_v40  ;;  %v890_v56 = vcombine.high %v865_v38, %v881_v40  ;;  %v905_v57 = vcombine.low %v872_v39, %v888_v42  ;;  %v906_v59 = vcombine.high %v872_v39, %v888_v42 }
 0x361   : > { %v925_v6 = vcombine.low %v836_v25, %v844_v60  ;;  %v926_v7 = vcombine.high %v836_v25, %v844_v60  ;;  %v677_v60 = vrot.slane %v669_v63, %v3848_v2 }
 0x362   : > { %v897_v1 = vrot.slane %v889_v55, %v3848_v2  ;;  %v904_v3 = vrot.slane %v890_v56, %v3848_v2  ;;  %v913_v4 = vrot.slane %v905_v57, %v3848_v2  ;;  %v920_v5 = vrot.slane %v906_v59, %v3848_v2 }
 0x363   : > { %v848_v8 = vpop.permute.xlu1 %847  ;;  %v933_v24 = vrot.slane %v925_v6, %v3837_v58  ;;  %v940_v25 = vrot.slane %v926_v7, %v3837_v58 }
 0x364   : > { %v993_v11 = vcombine.low %v897_v1, %v904_v3  ;;  %v3022_v12 = vcombine.high %v897_v1, %v904_v3  ;;  %v1009_v13 = vcombine.low %v913_v4, %v920_v5  ;;  %v3023_v14 = vcombine.high %v913_v4, %v920_v5 }
 0x365   : > { %v941_v18 = vcombine.low %v840_v44, %v848_v8  ;;  %v942_v19 = vcombine.high %v840_v44, %v848_v8 }
 0x366   : > { %v1000_v20 = vrot.slane %v993_v11, %v3837_v58  ;;  %v1008_v21 = vrot.slane %v3022_v12, %v3837_v58  ;;  %v1016_v22 = vrot.slane %v1009_v13, %v3837_v58  ;;  %v1024_v23 = vrot.slane %v3023_v14, %v3837_v58 }
 0x367   : > { %v949_v27 = vrot.slane %v941_v18, %v3837_v58  ;;  %v956_v32 = vrot.slane %v942_v19, %v3837_v58  ;;  %v753_v11 = vcombine.low %v729_v9, %v745_v10 }
 0x368   : > { %v1025_v33 = vcombine.low %v1000_v20, %v1008_v21  ;;  %v1041_v34 = vcombine.low %v1016_v22, %v1024_v23  ;;  %v1026_v35 = vcombine.high %v1000_v20, %v1008_v21  ;;  %v1042_v36 = vcombine.high %v1016_v22, %v1024_v23 }
 0x369   : > { %v957_v37 = vcombine.low %v933_v24, %v949_v27  ;;  %v958_v38 = vcombine.high %v933_v24, %v949_v27  ;;  %v973_v39 = vcombine.low %v940_v25, %v956_v32  ;;  %v974_v40 = vcombine.high %v940_v25, %v956_v32 }
 0x36a   : > { %v1033_v42 = vrot.slane %v1025_v33, %v3848_v2  ;;  %v1049_v44 = vrot.slane %v1041_v34, %v3848_v2  ;;  %v1040_v51 = vrot.slane %v1026_v35, %v3848_v2  ;;  %v1056_v53 = vrot.slane %v1042_v36, %v3848_v2 }
 0x36b   : > { %v965_v55 = vrot.slane %v957_v37, %v3848_v2  ;;  %v972_v56 = vrot.slane %v958_v38, %v3848_v2  ;;  %v981_v57 = vrot.slane %v973_v39, %v3848_v2  ;;  %v988_v59 = vrot.slane %v974_v40, %v3848_v2 }
 0x36c   : > { %v1057_v62 = vcombine.low %v1033_v42, %v1049_v44  ;;  %v1058_v1 = vcombine.high %v1033_v42, %v1049_v44  ;;  %v1059_v12 = vcombine.low %v1040_v51, %v1056_v53  ;;  %v754_v20 = vcombine.high %v729_v9, %v745_v10 }
 0x36d   : > { %v1061_v3 = vcombine.low %v965_v55, %v972_v56  ;;  %v3024_v4 = vcombine.high %v965_v55, %v972_v56  ;;  %v1077_v5 = vcombine.low %v981_v57, %v988_v59  ;;  %v3025_v6 = vcombine.high %v981_v57, %v988_v59 }
 0x36e   : > { %v1129_v7 = vpack.c.bf16 %v1057_v62, %v1057_v62  ;;  %v1130_v8 = vpack.c.bf16 %v1058_v1, %v1058_v1  ;;  %v1060_v21 = vcombine.high %v1040_v51, %v1056_v53  ;;  %v757_v22 = vcombine.low %v3905_v15, %v3908_v16 }
 0x36f   : > { %v1068_v13 = vrot.slane %v1061_v3, %v3837_v58  ;;  %v1076_v14 = vrot.slane %v3024_v4, %v3837_v58  ;;  %v1084_v18 = vrot.slane %v1077_v5, %v3837_v58  ;;  %v1092_v63 = vrot.slane %v3025_v6, %v3837_v58 }
 0x370   : > { %v1446_v0 = vsel %vm1441_vm3, %v1129_v7, 0  ;;  %v1492_v19 = vsel %vm1441_vm3, %v1130_v8, 0  ;;  %v3020_v25 = vcombine.high %v3905_v15, %v3908_v16  ;;  %v773_v27 = vcombine.low %v677_v60, %v684_v61 }
 0x371   : > { %3126 = vmatpush3.bf16.xpose.msra.mxu1 %v1446_v0  ;;  %3132 = vmatpush3.bf16.xpose.msra.mxu0 %v1492_v19  ;;  %v1093_v23 = vcombine.low %v1068_v13, %v1076_v14  ;;  %v1109_v24 = vcombine.low %v1084_v18, %v1092_v63  ;;  %v3021_v32 = vcombine.high %v677_v60, %v684_v61 }
 0x372   : > { %3137 = vmatprep.subr.bf16.mxu1 %v3557_v17  ;;  %3143 = vmatprep.subr.bf16.mxu0 %v3557_v17  ;;  %v1131_v33 = vpack.c.bf16 %v1059_v12, %v1059_v12  ;;  %v1132_v34 = vpack.c.bf16 %v1060_v21, %v1060_v21  ;;  %v825_v35 = vpack.c.bf16 %v753_v11, %v753_v11 }
 0x373   : > { %v1101_v9 = vrot.slane %v1093_v23, %v3848_v2  ;;  %v1117_v10 = vrot.slane %v1109_v24, %v3848_v2  ;;  %v826_v36 = vpack.c.bf16 %v754_v20, %v754_v20  ;;  %v736_v37 = vrot.slane %v722_v52, %v3848_v2 }
 0x374   : > { %v752_v15 = vrot.slane %v738_v54, %v3848_v2  ;;  %v764_v16 = vrot.slane %v757_v22, %v3837_v58  ;;  %v772_v38 = vrot.slane %v3020_v25, %v3837_v58  ;;  %v780_v39 = vrot.slane %v773_v27, %v3837_v58 }
 0x375   : > { %v788_v40 = vrot.slane %v3021_v32, %v3837_v58  ;;  %v1538_v42 = vsel %vm1441_vm3, %v1131_v33, 0  ;;  %v1094_v44 = vcombine.high %v1068_v13, %v1076_v14  ;;  %v1584_v28 = vsel %vm1441_vm3, %v1132_v34, 0 }
 0x376   : > { %v1125_v29 = vcombine.low %v1101_v9, %v1117_v10  ;;  %v1126_v30 = vcombine.high %v1101_v9, %v1117_v10  ;;  %v1110_v31 = vcombine.high %v1084_v18, %v1092_v63  ;;  %v755_v52 = vcombine.low %v736_v37, %v752_v15 }
 0x377   : > { %v756_v54 = vcombine.high %v736_v37, %v752_v15  ;;  %v789_v51 = vcombine.low %v764_v16, %v772_v38  ;;  %v805_v53 = vcombine.low %v780_v39, %v788_v40  ;;  %v1108_v57 = vrot.slane %v1094_v44, %v3848_v2 }
 0x378   : > { %3128 = vmatmul.mubr.msk.bf16.vlgmr.msra.gmra.mrb[0].mxu1 %vm1441_vm3, %v825_v35  ;;  %3134 = vmatmul.mubr.msk.bf16.vlgmr.msra.gmra.mrb[4].mxu0 %vm1441_vm3, %v826_v36  ;;  %v1133_v55 = vpack.c.bf16 %v1125_v29, %v1125_v29  ;;  %v1134_v56 = vpack.c.bf16 %v1126_v30, %v1126_v30  ;;  %v1124_v59 = vrot.slane %v1110_v31, %v3848_v2 }
 0x379   : > { %3138 = vmatpush3.bf16.xpose.msra.mxu1 %v1538_v42  ;;  %3144 = vmatpush3.bf16.xpose.msra.mxu0 %v1584_v28  ;;  %v827_v60 = vpack.c.bf16 %v755_v52, %v755_v52  ;;  %v828_v61 = vpack.c.bf16 %v756_v54, %v756_v54  ;;  %v797_v62 = vrot.slane %v789_v51, %v3848_v2 }
 0x37a   : > { %3139 = vmatprep.mubr.msk.bf16.mxu1 %vm3558_vm2, %v3557_v17  ;;  %3145 = vmatprep.mubr.msk.bf16.mxu0 %vm3558_vm2, %v3557_v17  ;;  %v813_v1 = vrot.slane %v805_v53, %v3848_v2  ;;  %v1630_v3 = vsel %vm1441_vm3, %v1133_v55, 0  ;;  %v1676_v4 = vsel %vm1441_vm3, %v1134_v56, 0  ;;  %v1127_v5 = vcombine.low %v1108_v57, %v1124_v59 }
 0x37b   : > { %3149 = vmatprep.subr.bf16.mxu1 %v3557_v17  ;;  %3155 = vmatprep.subr.bf16.mxu0 %v3557_v17  ;;  %v1128_v6 = vcombine.high %v1108_v57, %v1124_v59  ;;  %v790_v7 = vcombine.high %v764_v16, %v772_v38  ;;  %v806_v12 = vcombine.high %v780_v39, %v788_v40 }
 0x37c   : > { %v821_v8 = vcombine.low %v797_v62, %v813_v1  ;;  %v822_v11 = vcombine.high %v797_v62, %v813_v1  ;;  %v1135_v13 = vpack.c.bf16 %v1127_v5, %v1127_v5 }
 0x37d   : > { %v1136_v14 = vpack.c.bf16 %v1128_v6, %v1128_v6  ;;  %v804_v0 = vrot.slane %v790_v7, %v3848_v2  ;;  %v820_v19 = vrot.slane %v806_v12, %v3848_v2 }
 0x37e   : > { %v829_v18 = vpack.c.bf16 %v821_v8, %v821_v8  ;;  %v830_v63 = vpack.c.bf16 %v822_v11, %v822_v11  ;;  %v1722_v20 = vsel %vm1441_vm3, %v1135_v13, 0 }
 0x37f   : > { %v1768_v21 = vsel %vm1441_vm3, %v1136_v14, 0  ;;  %v823_v22 = vcombine.low %v804_v0, %v820_v19  ;;  %v824_v23 = vcombine.high %v804_v0, %v820_v19 }
 0x380   : > { %3140 = vmatmul.mubr.msk.bf16.vlgmr.msra.gmra.mrb[4].mxu1 %vm1441_vm3, %v827_v60  ;;  %3146 = vmatmul.mubr.msk.bf16.vlgmr.msra.gmra.mrb[8].mxu0 %vm1441_vm3, %v828_v61 }
 0x381   : > { %3150 = vmatpush3.bf16.xpose.msra.mxu1 %v1630_v3  ;;  %3156 = vmatpush3.bf16.xpose.msra.mxu0 %v1676_v4  ;;  %v831_v24 = vpack.c.bf16 %v823_v22, %v823_v22  ;;  %v832_v25 = vpack.c.bf16 %v824_v23, %v824_v23 }
 0x382   : > { %3151 = vmatprep.mubr.msk.bf16.mxu1 %vm3558_vm2, %v3557_v17  ;;  %3157 = vmatprep.mubr.msk.bf16.mxu0 %vm3558_vm2, %v3557_v17 }
 0x383   : > { %3161 = vmatprep.subr.bf16.mxu1 %v3557_v17  ;;  %3167 = vmatprep.subr.bf16.mxu0 %v3557_v17 }
 0x388   : > { %3152 = vmatmul.mubr.msk.bf16.vlgmr.msra.gmra.mrb[8].mxu1 %vm1441_vm3, %v829_v18  ;;  %3158 = vmatmul.mubr.msk.bf16.vlgmr.msra.gmra.mrb[12].mxu0 %vm1441_vm3, %v830_v63 }
 0x389   : > { %3162 = vmatpush3.bf16.xpose.msra.mxu1 %v1722_v20  ;;  %3168 = vmatpush3.bf16.xpose.msra.mxu0 %v1768_v21 }
 0x38a   : > { %3163 = vmatprep.mubr.msk.bf16.mxu1 %vm3558_vm2, %v3557_v17  ;;  %3169 = vmatprep.mubr.msk.bf16.mxu0 %vm3558_vm2, %v3557_v17 }
 0x38b   : > { %3173 = vmatprep.subr.bf16.mxu1 %v3557_v17  ;;  %3179 = vmatprep.subr.bf16.mxu0 %v3557_v17 }
 0x390   : > { %3164 = vmatmul.mubr.msk.bf16.vlgmr.msra.gmra.mrb[12].mxu1 %vm1441_vm3, %v831_v24  ;;  %3170 = vmatmul.mubr.msk.bf16.vlgmr.msra.gmra.mrb[16].mxu0 %vm1441_vm3, %v832_v25 }
 0x391   : > { %3175 = vmatprep.mubr.msk.bf16.mxu1 %vm3558_vm2, %v3557_v17  ;;  %3181 = vmatprep.mubr.msk.bf16.mxu0 %vm3558_vm2, %v3557_v17 }
 0x44b   : > { %v1482_v27 = vpop.f32.mrb[0].mxu1  ;;  %v1528_v32 = vpop.f32.mrb[4].mxu0 }
 0x44c   : > { %v3129_v33 = vpop.f32.mrb[1].mxu1  ;;  %v3135_v34 = vpop.f32.mrb[5].mxu0  ;;  %v1810_v9 = vsel %vm1441_vm3, %v1482_v27, -inf  ;;  %v1813_v10 = vsel %vm1441_vm3, %v1528_v32, -inf }
 0x44d   : > { %1811 = vmax.xlane.f32.xlu0 %v1810_v9  ;;  %v1485_v35 = vpop.f32.mrb[2].mxu1  ;;  %1814 = vmax.xlane.f32.xlu1 %v1813_v10  ;;  %v1531_v36 = vpop.f32.mrb[6].mxu0 }
 0x44e   : > { %v3130_v37 = vpop.f32.mrb[3].mxu1  ;;  %v3136_v15 = vpop.f32.mrb[7].mxu0 }
 0x453   : > { %v1574_v16 = vpop.f32.mrb[4].mxu1  ;;  %v1620_v38 = vpop.f32.mrb[8].mxu0 }
 0x454   : > { %v3141_v39 = vpop.f32.mrb[5].mxu1  ;;  %v3147_v40 = vpop.f32.mrb[9].mxu0  ;;  %v1816_v42 = vsel %vm1441_vm3, %v1574_v16, -inf  ;;  %v1819_v31 = vsel %vm1441_vm3, %v1620_v38, -inf }
 0x455   : > { %1817 = vmax.xlane.f32.xlu0 %v1816_v42  ;;  %v1577_v44 = vpop.f32.mrb[6].mxu1  ;;  %v1623_v28 = vpop.f32.mrb[10].mxu0 }
 0x456   : > { %v3142_v29 = vpop.f32.mrb[7].mxu1  ;;  %v3148_v30 = vpop.f32.mrb[11].mxu0 }
 0x459   : > { %1820 = vmax.xlane.f32.xlu0 %v1819_v31 }
 0x45b   : > { %v1666_v52 = vpop.f32.mrb[8].mxu1  ;;  %v1712_v54 = vpop.f32.mrb[12].mxu0 }
 0x45c   : > { %v3153_v51 = vpop.f32.mrb[9].mxu1  ;;  %v3159_v53 = vpop.f32.mrb[13].mxu0  ;;  %v1822_v55 = vsel %vm1441_vm3, %v1666_v52, -inf  ;;  %v1825_v56 = vsel %vm1441_vm3, %v1712_v54, -inf }
 0x45d   : > { %v1669_v57 = vpop.f32.mrb[10].mxu1  ;;  %1823 = vmax.xlane.f32.xlu0 %v1822_v55  ;;  %1826 = vmax.xlane.f32.xlu1 %v1825_v56  ;;  %v1715_v59 = vpop.f32.mrb[14].mxu0 }
 0x45e   : > { %v3154_v60 = vpop.f32.mrb[11].mxu1  ;;  %v3160_v61 = vpop.f32.mrb[15].mxu0 }
 0x463   : > { %v4002_v62 = vpop.f32.mrb[12].mxu1  ;;  %v4004_v1 = vpop.f32.mrb[16].mxu0 }
 0x464   : > { %v3165_v3 = vpop.f32.mrb[13].mxu1  ;;  %v3171_v4 = vpop.f32.mrb[17].mxu0  ;;  %v1828_v5 = vsel %vm1441_vm3, %v4002_v62, -inf  ;;  %v1831_v12 = vsel %vm1441_vm3, %v4004_v1, -inf }
 0x465   : > { %v1761_v6 = vpop.f32.mrb[14].mxu1  ;;  %1829 = vmax.xlane.f32.xlu0 %v1828_v5  ;;  %v1807_v7 = vpop.f32.mrb[18].mxu0 }
 0x466   : > { %v3166_v8 = vpop.f32.mrb[15].mxu1  ;;  %v3172_v11 = vpop.f32.mrb[19].mxu0 }
 0x46e   : > { %1141 = vrot.lane.b32.xlu1 %v3815_v46, %s3565_s9 }
 0x472   : > { %1145 = vrot.lane.b32.xlu1 %v3813_v45, %s3565_s9 }
 0x47b   : > { %1137 = vrot.lane.b32.xlu0 %v3802_v41, %s3565_s9 }
 0x496   : > { %1832 = vmax.xlane.f32.xlu1 %v1831_v12 }
 0x4a7   : > { %1149 = vrot.lane.b32.xlu1 %v3819_v47, %s3565_s9 }
 0x4da   : > { %v1812_v13 = vpop.xlane.xlu0 %1811  ;;  %v1815_v14 = vpop.xlane.xlu1 %1814 }
 0x4db   : > { %v1834_v18 = vsub.f32 %v1482_v27, %v1812_v13  ;;  %v1835_v63 = vsub.f32 %v1528_v32, %v1815_v14 }
 0x4dd   : > { %v1842_v0 = vmul.f32 1.442695, %v1834_v18  ;;  %v1844_v19 = vmul.f32 1.442695, %v1835_v63 }
 0x4df   : > { %3366 = vpow2.f32 %v1842_v0 }
 0x4e0   : > { %3368 = vpow2.f32 %v1844_v19 }
 0x4e2   : > { %v1818_v46 = vpop.xlane.xlu0 %1817 }
 0x4e3   : > { %v1836_v45 = vsub.f32 %v1574_v16, %v1818_v46 }
 0x4e5   : > { %v1846_v20 = vmul.f32 1.442695, %v1836_v45 }
 0x4e6   : > { %v1821_v21 = vpop.xlane.xlu0 %1820 }
 0x4e7   : > { %3370 = vpow2.f32 %v1846_v20  ;;  %v1837_v41 = vsub.f32 %v1620_v38, %v1821_v21 }
 0x4e9   : > { %v4018_v22 = vpop.eup %3366  ;;  %v1848_v23 = vmul.f32 1.442695, %v1837_v41 }
 0x4ea   : > { %v4020_v24 = vpop.eup %3368  ;;  %v1824_v47 = vpop.xlane.xlu0 %1823  ;;  %v1858_v27 = vsel %vm1441_vm3, %v4018_v22, 0.0 }
 0x4eb   : > { %v1827_v25 = vpop.xlane.xlu1 %1826  ;;  %3372 = vpow2.f32 %v1848_v23  ;;  %v1838_v32 = vsub.f32 %v1666_v52, %v1824_v47  ;;  %1859 = vadd.xlane.f32.xlu0 %v1858_v27  ;;  %v1861_v34 = vsel %vm1441_vm3, %v4020_v24, 0.0 }
 0x4ec   : > { %v1839_v33 = vsub.f32 %v1712_v54, %v1827_v25  ;;  %1862 = vadd.xlane.f32.xlu1 %v1861_v34 }
 0x4ed   : > { %v1850_v9 = vmul.f32 1.442695, %v1838_v32 }
 0x4ee   : > { %v1852_v10 = vmul.f32 1.442695, %v1839_v33 }
 0x4ef   : > { %3374 = vpow2.f32 %v1850_v9  ;;  %v1142_v42 = vpop.permute.xlu1 %1141 }
 0x4f0   : > { %3376 = vpow2.f32 %v1852_v10 }
 0x4f1   : > { %v4026_v35 = vpop.eup %3370 }
 0x4f2   : > { %v1864_v36 = vsel %vm1441_vm3, %v4026_v35, 0.0  ;;  %v1830_v44 = vpop.xlane.xlu0 %1829 }
 0x4f3   : > { %1865 = vadd.xlane.f32.xlu0 %v1864_v36  ;;  %v1840_v28 = vsub.f32 %v4002_v62, %v1830_v44  ;;  %v1146_v29 = vpop.permute.xlu1 %1145 }
 0x4f5   : > { %v4030_v37 = vpop.eup %3372  ;;  %v1854_v30 = vmul.f32 1.442695, %v1840_v28 }
 0x4f6   : > { %v1867_v15 = vsel %vm1441_vm3, %v4030_v37, 0.0  ;;  %v1138_v31 = vpop.permute.xlu0 %1137 }
 0x4f7   : > { %1868 = vadd.xlane.f32.xlu1 %v1867_v15  ;;  %3378 = vpow2.f32 %v1854_v30  ;;  %v1162_v51 = vcombine.high %v1138_v31, %v1146_v29 }
 0x4f9   : > { %v4034_v16 = vpop.eup %3374  ;;  %v1176_v56 = vrot.slane %v1162_v51, %v3837_v58 }
 0x4fa   : > { %v1870_v38 = vsel %vm1441_vm3, %v4034_v16, 0.0  ;;  %v4038_v39 = vpop.eup %3376 }
 0x4fb   : > { %1871 = vadd.xlane.f32.xlu0 %v1870_v38  ;;  %v1873_v40 = vsel %vm1441_vm3, %v4038_v39, 0.0 }
 0x4ff   : > { %1874 = vadd.xlane.f32.xlu0 %v1873_v40 }
 0x501   : > { %v4060_v7 = vpop.eup %3378 }
 0x502   : > { %v1876_v46 = vsel %vm1441_vm3, %v4060_v7, 0.0 }
 0x508   : > { %1143 = vrot.lane.b32.xlu1 %v3825_v49, %s3565_s9  ;;  %v1161_v49 = vcombine.low %v1138_v31, %v1146_v29 }
 0x50c   : > { %1147 = vrot.lane.b32.xlu1 %v3823_v48, %s3565_s9 }
 0x510   : > { %1151 = vrot.lane.b32.xlu1 %v3829_v50, %s3565_s9 }
 0x515   : > { %1139 = vrot.lane.b32.xlu0 %v3806_v43, %s3565_s9  ;;  %v1169_v43 = vrot.slane %v1161_v49, %v3837_v58 }
 0x523   : > { %v1833_v52 = vpop.xlane.xlu1 %1832 }
 0x524   : > { %v1841_v54 = vsub.f32 %v4004_v1, %v1833_v52 }
 0x526   : > { %v1856_v48 = vmul.f32 1.442695, %v1841_v54 }
 0x527   : > { %v1150_v53 = vpop.permute.xlu1 %1149 }
 0x528   : > { %3380 = vpow2.f32 %v1856_v48  ;;  %v1177_v50 = vcombine.low %v1142_v42, %v1150_v53  ;;  %v1178_v55 = vcombine.high %v1142_v42, %v1150_v53 }
 0x52a   : > { %v1185_v57 = vrot.slane %v1177_v50, %v3837_v58  ;;  %v1192_v59 = vrot.slane %v1178_v55, %v3837_v58 }
 0x52c   : > { %v1193_v60 = vcombine.low %v1169_v43, %v1185_v57  ;;  %v1194_v61 = vcombine.high %v1169_v43, %v1185_v57  ;;  %v1209_v62 = vcombine.low %v1176_v56, %v1192_v59  ;;  %v1210_v1 = vcombine.high %v1176_v56, %v1192_v59 }
 0x52e   : > { %v1201_v3 = vrot.slane %v1193_v60, %v3848_v2  ;;  %v1208_v4 = vrot.slane %v1194_v61, %v3848_v2  ;;  %v1217_v5 = vrot.slane %v1209_v62, %v3848_v2  ;;  %v1224_v6 = vrot.slane %v1210_v1, %v3848_v2 }
 0x530   : > { %v1297_v8 = vcombine.low %v1201_v3, %v1208_v4  ;;  %v3026_v11 = vcombine.high %v1201_v3, %v1208_v4  ;;  %v1313_v12 = vcombine.low %v1217_v5, %v1224_v6  ;;  %v3027_v13 = vcombine.high %v1217_v5, %v1224_v6 }
 0x532   : > { %v4062_v14 = vpop.eup %3380  ;;  %v1304_v18 = vrot.slane %v1297_v8, %v3837_v58  ;;  %v1312_v63 = vrot.slane %v3026_v11, %v3837_v58  ;;  %v1320_v0 = vrot.slane %v1313_v12, %v3837_v58  ;;  %v1328_v19 = vrot.slane %v3027_v13, %v3837_v58 }
 0x533   : > { %v1879_v45 = vsel %vm1441_vm3, %v4062_v14, 0.0 }
 0x534   : > { %1877 = vadd.xlane.f32.xlu0 %v1876_v46  ;;  %1880 = vadd.xlane.f32.xlu1 %v1879_v45  ;;  %v1329_v20 = vcombine.low %v1304_v18, %v1312_v63  ;;  %v1345_v21 = vcombine.low %v1320_v0, %v1328_v19  ;;  %v1330_v41 = vcombine.high %v1304_v18, %v1312_v63 }
 0x535   : > { %v1346_v23 = vcombine.high %v1320_v0, %v1328_v19 }
 0x536   : > { %v1337_v47 = vrot.slane %v1329_v20, %v3848_v2  ;;  %v1353_v25 = vrot.slane %v1345_v21, %v3848_v2  ;;  %v1344_v27 = vrot.slane %v1330_v41, %v3848_v2 }
 0x537   : > { %v1360_v32 = vrot.slane %v1346_v23, %v3848_v2 }
 0x538   : > { %v1361_v33 = vcombine.low %v1337_v47, %v1353_v25  ;;  %v1362_v34 = vcombine.high %v1337_v47, %v1353_v25 }
 0x539   : > { %v1363_v9 = vcombine.low %v1344_v27, %v1360_v32  ;;  %v1364_v10 = vcombine.high %v1344_v27, %v1360_v32 }
 0x53a   : > { %v1433_v36 = vpack.c.bf16 %v1361_v33, %v1361_v33  ;;  %v1434_v15 = vpack.c.bf16 %v1362_v34, %v1362_v34 }
 0x53b   : > { %v1435_v54 = vpack.c.bf16 %v1363_v9, %v1363_v9  ;;  %v1436_v51 = vpack.c.bf16 %v1364_v10, %v1364_v10 }
 0x53c   : > { %v1911_v38 = vsel %vm1909_vm4, %v1433_v36, 0  ;;  %v1957_v40 = vsel %vm1909_vm4, %v1434_v15, 0 }
 0x53d   : > { %3174 = vmatpush3.bf16.msra.mxu1 %v1911_v38  ;;  %3180 = vmatpush3.bf16.msra.mxu0 %v1957_v40  ;;  %v2003_v55 = vsel %vm1909_vm4, %v1435_v54, 0  ;;  %v2049_v56 = vsel %vm1909_vm4, %v1436_v51, 0 }
 0x53e   : > { %3185 = vmatprep.subr.bf16.mxu1 %v3557_v17  ;;  %3191 = vmatprep.subr.bf16.mxu0 %v3557_v17 }
 0x578   : > { %v1860_v42 = vpop.xlane.xlu0 %1859 }
 0x579   : > { %3382 = vrcp.f32 %v1860_v42  ;;  %v1863_v44 = vpop.xlane.xlu1 %1862 }
 0x57a   : > { %3384 = vrcp.f32 %v1863_v44 }
 0x580   : > { %v1866_v28 = vpop.xlane.xlu0 %1865 }
 0x581   : > { %3386 = vrcp.f32 %v1866_v28 }
 0x583   : > { %v3383_v29 = vpop.eup %3382 }
 0x584   : > { %v3385_v30 = vpop.eup %3384  ;;  %v1890_v31 = vmul.f32 %v3383_v29, %v4018_v22  ;;  %v1869_v52 = vpop.xlane.xlu1 %1868 }
 0x585   : > { %v1891_v49 = vmul.f32 %v3385_v30, %v4020_v24  ;;  %3388 = vrcp.f32 %v1869_v52 }
 0x586   : > { %v1898_v48 = vpack.c.bf16 %v1890_v31, %v1890_v31 }
 0x587   : > { %v1899_v53 = vpack.c.bf16 %v1891_v49, %v1891_v49 }
 0x588   : > { %v1872_v50 = vpop.xlane.xlu0 %1871  ;;  %3176 = vmatmul.mubr.msk.bf16.vlgmr.msra.gmra.mrb[16].mxu1 %vm1441_vm3, %v1898_v48  ;;  %v1144_v43 = vpop.permute.xlu1 %1143 }
 0x589   : > { %3182 = vmatmul.mubr.msk.bf16.vlgmr.msra.gmra.mrb[20].mxu0 %vm1441_vm3, %v1899_v53  ;;  %3186 = vmatpush3.bf16.msra.mxu1 %v2003_v55  ;;  %3390 = vrcp.f32 %v1872_v50 }
 0x58a   : > { %3192 = vmatpush3.bf16.msra.mxu0 %v2049_v56  ;;  %3187 = vmatprep.mubr.msk.bf16.mxu1 %vm3558_vm2, %v3557_v17 }
 0x58b   : > { %v3387_v22 = vpop.eup %3386  ;;  %3193 = vmatprep.mubr.msk.bf16.mxu0 %vm3558_vm2, %v3557_v17  ;;  %3197 = vmatprep.subr.bf16.mxu1 %v3557_v17 }
 0x58c   : > { %v1892_v24 = vmul.f32 %v3387_v22, %v4026_v35  ;;  %v1875_v57 = vpop.xlane.xlu0 %1874  ;;  %v1148_v59 = vpop.permute.xlu1 %1147  ;;  %3203 = vmatprep.subr.bf16.mxu0 %v3557_v17 }
 0x58d   : > { %3392 = vrcp.f32 %v1875_v57 }
 0x58e   : > { %v1900_v60 = vpack.c.bf16 %v1892_v24, %v1892_v24 }
 0x58f   : > { %v3389_v61 = vpop.eup %3388 }
 0x590   : > { %v1893_v62 = vmul.f32 %v3389_v61, %v4030_v37  ;;  %v1140_v1 = vpop.permute.xlu0 %1139  ;;  %3188 = vmatmul.mubr.msk.bf16.vlgmr.msra.gmra.mrb[20].mxu1 %vm1441_vm3, %v1900_v60  ;;  %v1152_v3 = vpop.permute.xlu1 %1151 }
 0x591   : > { %v1229_v4 = vcombine.low %v1140_v1, %v1148_v59  ;;  %v1230_v5 = vcombine.high %v1140_v1, %v1148_v59  ;;  %v1245_v6 = vcombine.low %v1144_v43, %v1152_v3  ;;  %v1246_v8 = vcombine.high %v1144_v43, %v1152_v3  ;;  %3199 = vmatprep.mubr.msk.bf16.mxu1 %vm3558_vm2, %v3557_v17 }
 0x592   : > { %v1901_v35 = vpack.c.bf16 %v1893_v62, %v1893_v62 }
 0x593   : > { %v1237_v11 = vrot.slane %v1229_v4, %v3837_v58  ;;  %v1244_v12 = vrot.slane %v1230_v5, %v3837_v58  ;;  %v1253_v13 = vrot.slane %v1245_v6, %v3837_v58  ;;  %v1260_v37 = vrot.slane %v1246_v8, %v3837_v58  ;;  %v3391_v38 = vpop.eup %3390 }
 0x594   : > { %3194 = vmatmul.mubr.msk.bf16.vlgmr.msra.gmra.mrb[24].mxu0 %vm1441_vm3, %v1901_v35  ;;  %v1894_v49 = vmul.f32 %v3391_v38, %v4034_v16 }
 0x595   : > { %v1261_v18 = vcombine.low %v1237_v11, %v1253_v13  ;;  %v1262_v63 = vcombine.high %v1237_v11, %v1253_v13  ;;  %v1277_v0 = vcombine.low %v1244_v12, %v1260_v37  ;;  %v1278_v19 = vcombine.high %v1244_v12, %v1260_v37  ;;  %3205 = vmatprep.mubr.msk.bf16.mxu0 %vm3558_vm2, %v3557_v17 }
 0x596   : > { %v1902_v22 = vpack.c.bf16 %v1894_v49, %v1894_v49 }
 0x597   : > { %v1269_v46 = vrot.slane %v1261_v18, %v3848_v2  ;;  %v1276_v45 = vrot.slane %v1262_v63, %v3848_v2  ;;  %v1285_v20 = vrot.slane %v1277_v0, %v3848_v2  ;;  %v1292_v21 = vrot.slane %v1278_v19, %v3848_v2  ;;  %v3393_v29 = vpop.eup %3392 }
 0x598   : > { %v1895_v51 = vmul.f32 %v3393_v29, %v4038_v39 }
 0x599   : > { %v1365_v41 = vcombine.low %v1269_v46, %v1276_v45  ;;  %v3028_v23 = vcombine.high %v1269_v46, %v1276_v45  ;;  %v1381_v47 = vcombine.low %v1285_v20, %v1292_v21  ;;  %v3029_v25 = vcombine.high %v1285_v20, %v1292_v21 }
 0x59a   : > { %v1903_v24 = vpack.c.bf16 %v1895_v51, %v1895_v51 }
 0x59b   : > { %v1372_v27 = vrot.slane %v1365_v41, %v3837_v58  ;;  %v1380_v32 = vrot.slane %v3028_v23, %v3837_v58  ;;  %v1388_v33 = vrot.slane %v1381_v47, %v3837_v58  ;;  %v1396_v34 = vrot.slane %v3029_v25, %v3837_v58 }
 0x59d   : > { %v1397_v9 = vcombine.low %v1372_v27, %v1380_v32  ;;  %v1413_v10 = vcombine.low %v1388_v33, %v1396_v34  ;;  %v1398_v36 = vcombine.high %v1372_v27, %v1380_v32  ;;  %v1414_v15 = vcombine.high %v1388_v33, %v1396_v34 }
 0x59f   : > { %v1405_v40 = vrot.slane %v1397_v9, %v3848_v2  ;;  %v1421_v42 = vrot.slane %v1413_v10, %v3848_v2  ;;  %v1412_v44 = vrot.slane %v1398_v36, %v3848_v2  ;;  %v1428_v28 = vrot.slane %v1414_v15, %v3848_v2 }
 0x5a1   : > { %v1429_v30 = vcombine.low %v1405_v40, %v1421_v42  ;;  %v1430_v31 = vcombine.high %v1405_v40, %v1421_v42  ;;  %v1431_v52 = vcombine.low %v1412_v44, %v1428_v28  ;;  %v1432_v54 = vcombine.high %v1412_v44, %v1428_v28 }
 0x5a3   : > { %v1437_v48 = vpack.c.bf16 %v1429_v30, %v1429_v30  ;;  %v1438_v53 = vpack.c.bf16 %v1430_v31, %v1430_v31  ;;  %v1439_v43 = vpack.c.bf16 %v1431_v52, %v1431_v52  ;;  %v1440_v56 = vpack.c.bf16 %v1432_v54, %v1432_v54 }
 0x5a5   : > { %v2095_v50 = vsel %vm1909_vm4, %v1437_v48, 0  ;;  %v2141_v55 = vsel %vm1909_vm4, %v1438_v53, 0  ;;  %v2187_v16 = vsel %vm1909_vm4, %v1439_v43, 0  ;;  %v2233_v39 = vsel %vm1909_vm4, %v1440_v56, 0 }
 0x5a6   : > { %3198 = vmatpush3.bf16.msra.mxu1 %v2095_v50  ;;  %3204 = vmatpush3.bf16.msra.mxu0 %v2141_v55 }
 0x5a7   : > { %3209 = vmatprep.subr.bf16.mxu1 %v3557_v17  ;;  %3215 = vmatprep.subr.bf16.mxu0 %v3557_v17 }
 0x5a9   : > { %3200 = vmatmul.mubr.msk.bf16.vlgmr.msra.gmra.mrb[24].mxu1 %vm1441_vm3, %v1902_v22  ;;  %3206 = vmatmul.mubr.msk.bf16.vlgmr.msra.gmra.mrb[28].mxu0 %vm1441_vm3, %v1903_v24 }
 0x5aa   : > { %3210 = vmatpush3.bf16.msra.mxu1 %v2187_v16  ;;  %3216 = vmatpush3.bf16.msra.mxu0 %v2233_v39 }
 0x5ab   : > { %3211 = vmatprep.mubr.msk.bf16.mxu1 %vm3558_vm2, %v3557_v17  ;;  %3217 = vmatprep.mubr.msk.bf16.mxu0 %vm3558_vm2, %v3557_v17 }
 0x5ac   : > { %3221 = vmatprep.subr.bf16.mxu1 %v3557_v17  ;;  %3229 = vmatprep.subr.bf16.mxu0 %v3557_v17 }
 0x5c1   : > { %v1878_v57 = vpop.xlane.xlu0 %1877  ;;  %v1881_v59 = vpop.xlane.xlu1 %1880 }
 0x5c2   : > { %3394 = vrcp.f32 %v1878_v57 }
 0x5c3   : > { %3396 = vrcp.f32 %v1881_v59 }
 0x5cc   : > { %v3395_v60 = vpop.eup %3394 }
 0x5cd   : > { %v3397_v61 = vpop.eup %3396  ;;  %v1896_v62 = vmul.f32 %v3395_v60, %v4060_v7 }
 0x5ce   : > { %v1897_v1 = vmul.f32 %v3397_v61, %v4062_v14 }
 0x5cf   : > { %v1904_v3 = vpack.c.bf16 %v1896_v62, %v1896_v62 }
 0x5d0   : > { %v1905_v4 = vpack.c.bf16 %v1897_v1, %v1897_v1 }
 0x5d1   : > { %3212 = vmatmul.mubr.msk.bf16.vlgmr.msra.gmra.mrb[28].mxu1 %vm1441_vm3, %v1904_v3 }
 0x5d2   : > { %3218 = vmatmul.mubr.msk.bf16.vlgmr.msra.gmra.mrb[32].mxu0 %vm1441_vm3, %v1905_v4  ;;  %3225 = vmatprep.mubr.msk.bf16.mxu1 %vm3558_vm2, %v3557_v17 }
 0x5d3   : > { %3233 = vmatprep.mubr.msk.bf16.mxu0 %vm3558_vm2, %v3557_v17 }
 0x65b   : > { %v1947_v5 = vpop.f32.mrb[16].mxu1 }
 0x65c   : > { %v1993_v6 = vpop.f32.mrb[20].mxu0  ;;  %v3177_v8 = vpop.f32.mrb[17].mxu1 }
 0x65d   : > { %v3183_v35 = vpop.f32.mrb[21].mxu0  ;;  %v1950_v11 = vpop.f32.mrb[18].mxu1 }
 0x65e   : > { %v1996_v7 = vpop.f32.mrb[22].mxu0  ;;  %v3178_v12 = vpop.f32.mrb[19].mxu1 }
 0x65f   : > { %v3184_v14 = vpop.f32.mrb[23].mxu0 }
 0x663   : > { %v2039_v13 = vpop.f32.mrb[20].mxu1 }
 0x664   : > { %v2275_v37 = vcombine.low %v1947_v5, %v2039_v13  ;;  %v2276_v18 = vcombine.high %v1947_v5, %v2039_v13  ;;  %v3189_v63 = vpop.f32.mrb[21].mxu1 }
 0x665   : > { %v2042_v0 = vpop.f32.mrb[22].mxu1 }
 0x666   : > { %v3190_v19 = vpop.f32.mrb[23].mxu1  ;;  %v2283_v23 = vrot.slane %v2275_v37, %v3837_v58  ;;  %v2290_v47 = vrot.slane %v2276_v18, %v3837_v58 }
 0x667   : > { %v2085_v46 = vpop.f32.mrb[24].mxu0 }
 0x668   : > { %v2291_v45 = vcombine.low %v1993_v6, %v2085_v46  ;;  %v2292_v20 = vcombine.high %v1993_v6, %v2085_v46  ;;  %v3195_v21 = vpop.f32.mrb[25].mxu0 }
 0x669   : > { %v2088_v41 = vpop.f32.mrb[26].mxu0 }
 0x66a   : > { %v2299_v25 = vrot.slane %v2291_v45, %v3837_v58  ;;  %v2306_v27 = vrot.slane %v2292_v20, %v3837_v58  ;;  %v3196_v32 = vpop.f32.mrb[27].mxu0 }
 0x66c   : > { %v2307_v33 = vcombine.low %v2283_v23, %v2299_v25  ;;  %v2308_v34 = vcombine.high %v2283_v23, %v2299_v25  ;;  %v2323_v9 = vcombine.low %v2290_v47, %v2306_v27  ;;  %v2324_v10 = vcombine.high %v2290_v47, %v2306_v27 }
 0x66e   : > { %v2315_v36 = vrot.slane %v2307_v33, %v3848_v2  ;;  %v2322_v15 = vrot.slane %v2308_v34, %v3848_v2  ;;  %v2331_v38 = vrot.slane %v2323_v9, %v3848_v2  ;;  %v2338_v40 = vrot.slane %v2324_v10, %v3848_v2 }
 0x670   : > { %v2411_v42 = vcombine.low %v2315_v36, %v2322_v15  ;;  %v3046_v44 = vcombine.high %v2315_v36, %v2322_v15  ;;  %v2427_v28 = vcombine.low %v2331_v38, %v2338_v40  ;;  %v3047_v29 = vcombine.high %v2331_v38, %v2338_v40  ;;  %v3354_v36 = vld [vmem:[%s3765_s19] sm:$0xff]  }
 0x671   : > { %3222 = vmatpush3.bf16.msra.mxu1 %v3354_v36  ;;  %v3356_v36 = vld [vmem:[%s3770_s30] sm:$0xff]  }
 0x672   : > { %v2418_v30 = vrot.slane %v2411_v42, %v3837_v58  ;;  %v2426_v31 = vrot.slane %v3046_v44, %v3837_v58  ;;  %v2434_v52 = vrot.slane %v2427_v28, %v3837_v58  ;;  %v2442_v54 = vrot.slane %v3047_v29, %v3837_v58  ;;  %3223 = vmatprep.subr.bf16.mxu1 %v3557_v17 }
 0x673   : > { %3230 = vmatpush3.bf16.msra.mxu0 %v3356_v36 }
 0x674   : > { %v2444_v49 = vcombine.high %v2418_v30, %v2426_v31  ;;  %v2460_v51 = vcombine.high %v2434_v52, %v2442_v54  ;;  %v2443_v48 = vcombine.low %v2418_v30, %v2426_v31  ;;  %v2459_v53 = vcombine.low %v2434_v52, %v2442_v54  ;;  %v3355_v31 = vld [vmem:[%s3765_s19 + $0x8] sm:$0xff]   ;;  %s3567_s19 = smov 8   ;;  %3231 = vmatprep.subr.bf16.mxu0 %v3557_v17 }
 0x675   : > { %3224 = vmatpush3.bf16.msra.mxu1 %v3355_v31 }
 0x676   : > { %v4153_v50 = vrot.slane %v2444_v49, %v3848_v2  ;;  %v4156_v55 = vrot.slane %v2460_v51, %v3848_v2  ;;  %v4159_v43 = vrot.slane %v2443_v48, %v3848_v2  ;;  %v4162_v56 = vrot.slane %v2459_v53, %v3848_v2  ;;  %3237 = vmatprep.subr.bf16.mxu1 %v3557_v17 }
 0x678   : > { %v2477_v22 = vcombine.low %v4153_v50, %v4156_v55  ;;  %v2475_v24 = vcombine.low %v4159_v43, %v4162_v56  ;;  %v2476_v16 = vcombine.high %v4159_v43, %v4162_v56  ;;  %v2478_v39 = vcombine.high %v4153_v50, %v4156_v55  ;;  %v4204_v56 = vld [vmem:[%s4317_s13] sm:$0xff] }
 0x679   : > { %v2586_v43 = vsub.s32 2, %v3793_v26 }
 0x67c   : > { %v2131_v57 = vpop.f32.mrb[24].mxu1  ;;  %v2177_v59 = vpop.f32.mrb[28].mxu0 }
 0x67d   : > { %v3201_v60 = vpop.f32.mrb[25].mxu1  ;;  %v3207_v61 = vpop.f32.mrb[29].mxu0 }
 0x67e   : > { %v2134_v62 = vpop.f32.mrb[26].mxu1  ;;  %v2180_v1 = vpop.f32.mrb[30].mxu0 }
 0x67f   : > { %v3202_v3 = vpop.f32.mrb[27].mxu1  ;;  %v3208_v4 = vpop.f32.mrb[31].mxu0 }
 0x6a4   : > { %v2223_v5 = vpop.f32.mrb[28].mxu1 }
 0x6a5   : > { %v2343_v6 = vcombine.low %v2131_v57, %v2223_v5  ;;  %v2344_v8 = vcombine.high %v2131_v57, %v2223_v5  ;;  %v2269_v35 = vpop.f32.mrb[32].mxu0  ;;  %v3213_v11 = vpop.f32.mrb[29].mxu1 }
 0x6a6   : > { %v2359_v7 = vcombine.low %v2177_v59, %v2269_v35  ;;  %v2360_v12 = vcombine.high %v2177_v59, %v2269_v35  ;;  %v3219_v14 = vpop.f32.mrb[33].mxu0  ;;  %v2226_v13 = vpop.f32.mrb[30].mxu1 }
 0x6a7   : > { %v2351_v37 = vrot.slane %v2343_v6, %v3837_v58  ;;  %v2358_v18 = vrot.slane %v2344_v8, %v3837_v58  ;;  %v2272_v63 = vpop.f32.mrb[34].mxu0  ;;  %v3214_v0 = vpop.f32.mrb[31].mxu1 }
 0x6a8   : > { %v2367_v19 = vrot.slane %v2359_v7, %v3837_v58  ;;  %v2374_v46 = vrot.slane %v2360_v12, %v3837_v58  ;;  %v3220_v45 = vpop.f32.mrb[35].mxu0 }
 0x6aa   : > { %v2375_v20 = vcombine.low %v2351_v37, %v2367_v19  ;;  %v2376_v21 = vcombine.high %v2351_v37, %v2367_v19  ;;  %v2391_v41 = vcombine.low %v2358_v18, %v2374_v46  ;;  %v2392_v23 = vcombine.high %v2358_v18, %v2374_v46  ;;  %v3407_v18 = vld [vmem:[#allocation2] sm:$0xff]  ;;  %v3408_v46 = vld [vmem:[#allocation2 + $0x8] sm:$0xff] }
 0x6ac   : > { %v2383_v47 = vrot.slane %v2375_v20, %v3848_v2  ;;  %v2390_v25 = vrot.slane %v2376_v21, %v3848_v2  ;;  %v2399_v27 = vrot.slane %v2391_v41, %v3848_v2  ;;  %v2406_v32 = vrot.slane %v2392_v23, %v3848_v2 }
 0x6ae   : > { %v2479_v33 = vcombine.low %v2383_v47, %v2390_v25  ;;  %v3048_v34 = vcombine.high %v2383_v47, %v2390_v25  ;;  %v2495_v9 = vcombine.low %v2399_v27, %v2406_v32  ;;  %v3049_v10 = vcombine.high %v2399_v27, %v2406_v32 }
 0x6b0   : > { %v2486_v15 = vrot.slane %v2479_v33, %v3837_v58  ;;  %v2494_v38 = vrot.slane %v3048_v34, %v3837_v58  ;;  %v2502_v40 = vrot.slane %v2495_v9, %v3837_v58  ;;  %v2510_v42 = vrot.slane %v3049_v10, %v3837_v58 }
 0x6b2   : > { %v2512_v44 = vcombine.high %v2486_v15, %v2494_v38  ;;  %v2528_v28 = vcombine.high %v2502_v40, %v2510_v42  ;;  %v2511_v29 = vcombine.low %v2486_v15, %v2494_v38  ;;  %v2527_v30 = vcombine.low %v2502_v40, %v2510_v42  ;;  %v3357_v15 = vld [vmem:[%s3770_s30 + $0x8] sm:$0xff]  }
 0x6b3   : > { %3232 = vmatpush3.bf16.msra.mxu0 %v3357_v15 }
 0x6b4   : > { %v2526_v52 = vrot.slane %v2512_v44, %v3848_v2  ;;  %v2542_v54 = vrot.slane %v2528_v28, %v3848_v2  ;;  %v2519_v49 = vrot.slane %v2511_v29, %v3848_v2  ;;  %v2535_v51 = vrot.slane %v2527_v30, %v3848_v2 }
 0x6b5   : > { %v2674_v30 = vsub.s32 3, %v3793_v26 }
 0x6b6   : > { %v2545_v58 = vcombine.low %v2526_v52, %v2542_v54  ;;  %v2544_v48 = vcombine.high %v2519_v49, %v2535_v51  ;;  %v2543_v53 = vcombine.low %v2519_v49, %v2535_v51  ;;  %v2546_v50 = vcombine.high %v2526_v52, %v2542_v54 }
 0x6b7   : > { %v2675_v52 = vrot.slane %v4204_v56, %v2674_v30  ;;  %v2680_v49 = vsub.s32 4, %v3793_v26 }
 0x6b8   : > { %v3342_v55 = vpack.i.bf16 %v2545_v58, %v2477_v22  ;;  %v3337_v57 = vpack.i.bf16 %v2544_v48, %v2476_v16  ;;  %v3347_v59 = vpack.i.bf16 %v2546_v50, %v2478_v39 }
 0x6ba   : > { %3343 = vrot.lane.b32.xlu1 %v3342_v55, %s3566_s17  ;;  %3338 = vrot.lane.b32.xlu0 %v3337_v57, %s3567_s19 }
 0x6be   : > { %3348 = vrot.lane.b32.xlu0 %v3347_v59, %s3568_s16 }
 0x72c   : > { %v3344_v60 = vpop.permute.xlu1 %3343  ;;  %v3339_v61 = vpop.permute.xlu0 %3338 }
 0x72d   : > { %v3341_v2 = vunpack.i.h.bf16 %v3339_v61  ;;  %v3340_v62 = vunpack.i.l.bf16 %v3339_v61  ;;  %v3346_v1 = vunpack.i.h.bf16 %v3344_v60  ;;  %v3345_v3 = vunpack.i.l.bf16 %v3344_v60  ;;  %v3358_v60 = vld [vmem:[%s3776_s24] sm:$0xff]   ;;  %v3359_v61 = vld [vmem:[%s3776_s24 + $0x8] sm:$0xff]  }
 0x72f   : > { %v2571_v22 = vsel %vm1441_vm3, %v2475_v24, %v3340_v62  ;;  %v2572_v16 = vsel %vm1441_vm3, %v2543_v53, %v3341_v2  ;;  %v2587_v24 = vrot.slane %v4204_v56, %v2586_v43  ;;  %v2681_v53 = vrot.slane %v4204_v56, %v2680_v49  ;;  %v3360_v2 = vld [vmem:[%s3776_s24 + $0x10] sm:$0xff]   ;;  %v3361_v62 = vld [vmem:[%s3776_s24 + $0x18] sm:$0xff]  }
 0x730   : > { %v3349_v39 = vpop.permute.xlu0 %3348  ;;  %v2574_v6 = vsel %vm2573_vm5, %v2571_v22, %v3345_v3  ;;  %v2575_v8 = vsel %vm2573_vm5, %v2572_v16, %v3346_v1  ;;  %v3053_v1 = vld [vmem:[%s4318_s8] ss:$0 sm:$0xff] }
 0x731   : > { %v3351_v4 = vunpack.i.h.bf16 %v3349_v39  ;;  %v3350_v5 = vunpack.i.l.bf16 %v3349_v39 }
 0x733   : > { %v2577_v35 = vsel %vm2576_vm6, %v2574_v6, %v3350_v5  ;;  %v2578_v11 = vsel %vm2576_vm6, %v2575_v8, %v3351_v4 }
 0x734   : > { %v2579_v7 = vpack.c.bf16 %v2578_v11, %v2577_v35 }
 0x736   : > { %3226 = vmatmul.mubr.msk.bf16.vlgmr.msra.gmra.mrb[32].mxu1 %vm432_vm1, %v2579_v7 }
 0x737   : > { %3245 = vmatprep.mubr.msk.bf16.mxu1 %vm3558_vm2, %v3557_v17  ;;  %3238 = vmatpush3.bf16.msra.mxu1 %v3358_v60 }
 0x738   : > { %3239 = vmatprep.subr.bf16.mxu1 %v3557_v17 }
 0x73b   : > { %3240 = vmatpush3.bf16.msra.mxu1 %v3359_v61 }
 0x73c   : > { %3241 = vmatprep.subr.bf16.mxu1 %v3557_v17 }
 0x73f   : > { %3242 = vmatpush3.bf16.msra.mxu1 %v3360_v2 }
 0x740   : > { %3243 = vmatprep.subr.bf16.mxu1 %v3557_v17 }
 0x743   : > { %3244 = vmatpush3.bf16.msra.mxu1 %v3361_v62 }
 0x809   : > { %v2637_v12 = vpop.f32.mrb[32].mxu1 }
 0x80a   : > { %v2638_v14 = vadd.f32 %v2637_v12, %v2587_v24  ;;  %v3227_v13 = vpop.f32.mrb[33].mxu1 }
 0x80b   : > { %v2640_v37 = vpop.f32.mrb[34].mxu1 }
 0x80c   : > { %v4207_v63 = vadd.f32 %v3407_v18, %v2638_v14  ;;  %v2641_v0 = vadd.f32 %v2640_v37, %v2587_v24  ;;  %v3228_v19 = vpop.f32.mrb[35].mxu1  ;;  %v2772_v37 = vsub.s32 5, %v3793_v26 }
 0x80e   : > { %v4209_v45 = vadd.f32 %v3408_v46, %v2641_v0  ;;  %v2646_v20 = vsel %vm432_vm1, %v4207_v63, 0.0  ;;  %v2773_v18 = vrot.slane %v4204_v56, %v2772_v37 }
 0x80f   : > { %2647 = vadd.xlane.f32.xlu1 %v2646_v20 }
 0x810   : > { %v2649_v21 = vsel %vm432_vm1, %v4209_v45, 0.0 }
 0x811   : > { %2650 = vadd.xlane.f32.xlu0 %v2649_v21 }
 0x89c   : > { %v2648_v41 = vpop.xlane.xlu1 %2647 }
 0x89d   : > { %v2652_v23 = vmul.f32 0.03125, %v2648_v41 }
 0x89e   : > { %v2651_v47 = vpop.xlane.xlu0 %2650 }
 0x89f   : > { %v2654_v25 = vsub.f32 %v4207_v63, %v2652_v23  ;;  %v2653_v27 = vmul.f32 0.03125, %v2651_v47 }
 0x8a1   : > { %v2655_v32 = vsub.f32 %v4209_v45, %v2653_v27  ;;  %v2656_v33 = vmul.f32 %v2654_v25, %v2654_v25 }
 0x8a3   : > { %v2658_v34 = vsel %vm432_vm1, %v2656_v33, 0.0  ;;  %v2657_v9 = vmul.f32 %v2655_v32, %v2655_v32 }
 0x8a4   : > { %2659 = vadd.xlane.f32.xlu0 %v2658_v34 }
 0x8a5   : > { %v2661_v10 = vsel %vm432_vm1, %v2657_v9, 0.0 }
 0x8a8   : > { %2662 = vadd.xlane.f32.xlu0 %v2661_v10 }
 0x931   : > { %v2660_v38 = vpop.xlane.xlu0 %2659 }
 0x932   : > { %v2664_v40 = vmul.f32 0.03125, %v2660_v38 }
 0x934   : > { %v2666_v42 = vadd.f32 1e-05, %v2664_v40 }
 0x935   : > { %v2663_v44 = vpop.xlane.xlu0 %2662 }
 0x936   : > { %3398 = vrsqrt.f32 %v2666_v42  ;;  %v2665_v28 = vmul.f32 0.03125, %v2663_v44 }
 0x938   : > { %v2667_v29 = vadd.f32 1e-05, %v2665_v28 }
 0x93a   : > { %3400 = vrsqrt.f32 %v2667_v29 }
 0x940   : > { %v3399_v31 = vpop.eup %3398 }
 0x941   : > { %v2670_v54 = vmul.f32 %v3399_v31, %v2654_v25 }
 0x943   : > { %v2676_v58 = vmul.f32 %v2675_v52, %v2670_v54 }
 0x944   : > { %v3401_v51 = vpop.eup %3400 }
 0x945   : > { %v2671_v48 = vmul.f32 %v3401_v51, %v2655_v32  ;;  %v2682_v55 = vadd.f32 %v2681_v53, %v2676_v58 }
 0x947   : > { %v2677_v50 = vmul.f32 %v2675_v52, %v2671_v48 }
 0x949   : > { %v2683_v57 = vadd.f32 %v2681_v53, %v2677_v50 }
 0x94b   : > { %v2684_v59 = vpack.c.bf16 %v2683_v57, %v2682_v55 }
 0x94d   : > { %3234 = vmatmul.mubr.msk.bf16.vlgmr.msra.gmra.mrb[36].mxu0 %vm432_vm1, %v2684_v59 }
 0xa20   : > { %v2744_v3 = vpop.f32.mrb[36].mxu0 }
 0xa21   : > { %v2745_v22 = vadd.f32 %v3053_v1, %v2744_v3  ;;  %v3235_v16 = vpop.f32.mrb[37].mxu0 }
 0xa22   : > { %v2747_v39 = vpop.f32.mrb[38].mxu0 }
 0xa23   : > { %v2753_v4 = vmul.f32 0.70710677, %v2745_v22  ;;  %v2748_v5 = vadd.f32 %v3053_v1, %v2747_v39  ;;  %v3236_v6 = vpop.f32.mrb[39].mxu0  ;;  %v2751_v7 = vmul.f32 0.5, %v2745_v22 }
 0xa25   : > { %3402 = verf.f32 %v2753_v4  ;;  %v2754_v8 = vmul.f32 0.70710677, %v2748_v5  ;;  %v2752_v43 = vmul.f32 0.5, %v2748_v5 }
 0xa27   : > { %3404 = verf.f32 %v2754_v8 }
 0xa2f   : > { %v3403_v35 = vpop.eup %3402 }
 0xa30   : > { %v2757_v11 = vadd.f32 1.0, %v3403_v35 }
 0xa31   : > { %v3405_v17 = vpop.eup %3404 }
 0xa32   : > { %v2758_v24 = vadd.f32 1.0, %v3405_v17  ;;  %v2759_v12 = vmul.f32 %v2757_v11, %v2751_v7 }
 0xa34   : > { %v2760_v14 = vmul.f32 %v2758_v24, %v2752_v43 }
 0xa36   : > { %v2761_v13 = vpack.c.bf16 %v2760_v14, %v2759_v12 }
 0xa38   : > { %3246 = vmatmul.mubr.msk.bf16.vlgmr.msra.gmra.mrb[36].mxu1 %vm2798_vm7, %v2761_v13 }
 0xb0b   : > { %v2836_v0 = vpop.f32.mrb[36].mxu1 }
 0xb0c   : > { %v2837_v19 = vadd.f32 %v2836_v0, %v2773_v18  ;;  %v3247_v46 = vpop.f32.mrb[37].mxu1  ;;  %2850 = sbr.rel (%p3062_p1) target bundleno = 2835 (0xb13), region = 64 }
 0xb0d   : > { %v2839_v20 = vpop.f32.mrb[38].mxu1 }
 0xb0e   : > { %v2843_v21 = vadd.f32 %v2837_v19, %v4207_v63  ;;  %v2840_v41 = vadd.f32 %v2839_v20, %v2773_v18  ;;  %v3248_v23 = vpop.f32.mrb[39].mxu1 }
 0xb10   : > { %2845 = vst.msk [vmem:[#allocation2] sm:$0xff] %vm432_vm1, %v2843_v21  ;;  %v2844_v47 = vadd.f32 %v2840_v41, %v4209_v45  ;;  %2851 = vst.msk [vmem:[#allocation8] sm:$0xff] (!%p3062_p1), %vm432_vm1, %v2843_v21 }
 0xb12   : > { %2846 = vst.msk [vmem:[#allocation2 + $0x8] sm:$0xff] %vm432_vm1, %v2844_v47  ;;  %2852 = vst.msk [vmem:[#allocation8 + $0x8] sm:$0xff] (!%p3062_p1), %vm432_vm1, %v2844_v47 }
 0xb13 PF: > { %s4319_s10 = sadd.s32 4294967295, %s3551_s29   ;;  %s3569_s12 = smov [#allocation8]  }
 0xb14   : > { %p4250_p5 = scmp.eq.s32.totalorder %s4319_s10, 1  ;;  %s2862_s11 = sshll.u32 %s3569_s12, 4  ;;  %s2863_s11 = int_to_ptr.vmem [resolvable:$true] %s2862_s11 }
 0xb15   : > { %s3467_s15 = scalar_lea.vmem %s2863_s11, 256  ;;  %p3474_p11 = scmp.lt.s32.totalorder %s2863_s11, %s2863_s11 }
 0xb16   : > { %p3468_p8 = scmp.ne.s32.totalorder %s2863_s11, %s3467_s15  ;;  %p3475_p13 = scmp.lt.s32.totalorder %s3467_s15, %s3467_s15 }
 0xb18   : > { %p3469_p9 = pnand %p3468_p8, %p4250_p5  ;;  %p3476_p2 = por %p3475_p13, %p3474_p11 }
 0xb1a   : > { %p3470_p10 = pneg %p3469_p9 }
 0xb1c   : > { %p3477_p3 = pnand %p3476_p2, %p3470_p10 }
 0xb1e   : > { %3480 = shalt.err (!%p3477_p3)
}
 0xb1f   : > { %s3481_s18 = scalar_lea.hbm %s4302_s7, 256 }
 0xb20   : > { %p3482_p0 = scmp.ne.s32.totalorder %s4302_s7, %s3481_s18  ;;  %p3487_p7 = scmp.lt.u32.totalorder %s3481_s18, %s4302_s7 }
 0xb22   : > { %p3483_p12 = pnand %p3482_p0, %p4250_p5 }
 0xb24   : > { %p3484_p6 = pneg %p3483_p12 }
 0xb26   : > { %p3489_p4 = pnand %p3487_p7, %p3484_p6 }
 0xb28   : > { %3492 = shalt.err (!%p3489_p4)
}
 0xb29   : > { %s3570_s13 = smov 128  }
 0xb2a   : > { %3256 = dma.vmem_to_hbm [thread:$0]  (%p4250_p5), %s2863_s11, 256, %s4302_s7, [#allocation5], %s3570_s13, %s3570_s13, %s3567_s19  }
 0xb2b   : > { %3526 = dma.done.wait (%p4250_p5), [#allocation5], 256  }
 0xb2c   : > { %3528 = vsyncadd (%p4250_p5), [#allocation5], 4294967040 }
 0xb2d PF: > { %s22_s29 = sadd.s32 1, %s3551_s29   ;;  %s4321_s24 = smov %s3535_s25 }
 0xb2e   : > { %p19_p1 = scmp.ge.s32.totalorder %s22_s29, 4   ;;  %s4322_s25 = smov %s3539_s26 }
 0xb2f   : > { %s4323_s26 = smov %s3696_s21  ;;  %s4324_s27 = smov %s3547_s28 }
 0xb30   : > { %s4325_s28 = smov %s4327_s14  ;;  %21 = sbr.rel (!%p19_p1) target bundleno = 6 (0x6), region = 115 }
 0xb37   :  { %2878 = vsyncpa [#allocation4], 1 }
 0xb38   :  { %2880 = vsyncpa [#allocation4 + $0x1], 1 }
 0xb39   :  { %2881 = vsyncpa [#allocation7], 1 }
 0xb3a   :  { %2883 = vsyncpa [#allocation7 + $0x1], 1 }
 0xb3b   :  { %2884 = vsyncpa [#allocation5], 1 }
 0xb3c   :  { %2886 = vsyncpa [#allocation5 + $0x1], 1 }

</bundles_post_ra>
